<compile_context>
chip_gen: v6e
topology: v6e:2x2x1
jax: 0.10.0
libtpu: 0.0.40
codegen_flags: <defaults>
</compile_context>

<pallas_src>
import functools

import jax
import jax.numpy as jnp
from jax import lax
from jax.experimental import pallas as pl
from jax.experimental.pallas import tpu as pltpu


# ----------------------------------------------------------------------------- config
class Config:
    num_layers = 2
    num_heads = 4
    dropout_p = 0.0          # identity dropout (eval semantics)
    prenorm = True
    embed_module = True
    embed_message_flag = True


# ------------------------------------------------------------------ in-kernel helpers
def _layer_norm(x, gamma, beta, eps=1e-5):
    mu = jnp.mean(x, axis=-1, keepdims=True)
    var = jnp.mean((x - mu) ** 2, axis=-1, keepdims=True)
    return (x - mu) * lax.rsqrt(var + eps) * gamma + beta


# Row layout of the packed per-layer vector slab (each row zero-padded to 3h lanes).
(_ROW_BQKV, _ROW_BO, _ROW_LN1G, _ROW_LN1B,
 _ROW_BFF1, _ROW_BFF2, _ROW_LN2G, _ROW_LN2B) = range(8)


# ------------------------------------------------------------ fused whole-forward kernel
def _fused_encoder_kernel(x_ref, extras_ref, vecs_ref,
                          wqkv_ref, wo_ref, wff1_ref, wff2_ref, o_ref,
                          *, num_layers, n_head, d_head, scale, prenorm):
    bb, k_tok, h = x_ref.shape            # one batch block per grid step
    rows = bb * k_tok

    extras = extras_ref[...].astype(jnp.float32)               # (k+1, h): emb rows + flag row
    x3 = x_ref[...].astype(jnp.float32)                        # (bb, k, h)
    x3 = x3 + extras[0:k_tok, :]                               # module embedding (zeros if off)
    x = x3.reshape(rows, h)                                    # (rows, h): all rows batched

    for li in range(num_layers):                               # num_layers small; unrolled
        # per-layer parameter reads, hoisted once per layer (never inside the head loop)
        wqkv = wqkv_ref[li]
        wo = wo_ref[li]
        wff1 = wff1_ref[li]
        wff2 = wff2_ref[li]
        vl = vecs_ref[li].astype(jnp.float32)                  # (8, 3h) packed bias/LN rows
        bqkv = vl[_ROW_BQKV:_ROW_BQKV + 1, :]                  # (1, 3h)
        bo = vl[_ROW_BO:_ROW_BO + 1, :h]                       # (1, h)
        g1 = vl[_ROW_LN1G:_ROW_LN1G + 1, :h]
        b1 = vl[_ROW_LN1B:_ROW_LN1B + 1, :h]
        bff1 = vl[_ROW_BFF1:_ROW_BFF1 + 1, :2 * h]             # (1, 2h)
        bff2 = vl[_ROW_BFF2:_ROW_BFF2 + 1, :h]
        g2 = vl[_ROW_LN2G:_ROW_LN2G + 1, :h]
        b2 = vl[_ROW_LN2B:_ROW_LN2B + 1, :h]

        # ---- self-attention block ----
        residual = x
        xin = _layer_norm(x, g1, b1) if prenorm else x

        # fused qkv projection over all rows at once: (rows, h) @ (h, 3h)
        qkv = jnp.dot(xin, wqkv, preferred_element_type=jnp.float32) + bqkv   # (rows, 3h)

        head_outs = []
        for hh in range(n_head):                               # tiny; unrolled, stays in vregs
            c = hh * d_head
            q_h = qkv[:, c:c + d_head].reshape(bb, k_tok, d_head)
            k_h = qkv[:, h + c:h + c + d_head].reshape(bb, k_tok, d_head)
            v_h = qkv[:, 2 * h + c:2 * h + c + d_head].reshape(bb, k_tok, d_head)

            # logits[b, i, j] = q_i . k_j  (== torch einsum 'ibhd,jbhd->ijbh' per b, head)
            logits = jnp.einsum('bqd,bkd->bqk', q_h, k_h,
                                preferred_element_type=jnp.float32) * scale
            # no max-subtract: |scaled logits| ~ 1e-9, softmax is shift-invariant
            e = jnp.exp(logits)
            probs = e / jnp.sum(e, axis=-1, keepdims=True)     # exact divide (tight vs ref)
            # TODO(synk): dropout_p == 0.0 -> drop_layer is the identity (not implemented).
            head_outs.append(jnp.einsum('bqk,bkd->bqd', probs, v_h,
                                        preferred_element_type=jnp.float32))

        attn = jnp.concatenate(head_outs, axis=-1).reshape(rows, h)   # assembled in registers
        attn = jnp.dot(attn, wo, preferred_element_type=jnp.float32) + bo

        x = residual + attn
        if not prenorm:
            x = _layer_norm(x, g1, b1)

        # ---- position-wise FFN block ----
        residual = x
        xin = _layer_norm(x, g2, b2) if prenorm else x
        hid = jnp.maximum(
            jnp.dot(xin, wff1, preferred_element_type=jnp.float32) + bff1, 0.0)
        ff = jnp.dot(hid, wff2, preferred_element_type=jnp.float32) + bff2
        x = residual + ff
        if not prenorm:
            x = _layer_norm(x, g2, b2)

    x = x + extras[k_tok:k_tok + 1, :]                         # message flag (zeros if off)
    o_ref[...] = x.reshape(bb, k_tok, h).astype(o_ref.dtype)


# ----------------------------------------------------- one-time parameter packing (hoisted)
def prepare_params(params, cfg, hidden, num_modules):
    """Stack/pack per-layer parameters ONCE (at init), not on every forward call."""
    h = hidden
    layers = params["layers"]

    def stack(name):
        return jnp.stack([lp[name] for lp in layers])

    def pad_row(v, width):                       # v: (1, w) -> (1, width), zero-padded
        return jnp.pad(v, ((0, 0), (0, width - v.shape[1])))

    vec_slabs = []
    for lp in layers:
        rows = [lp["bqkv"], lp["bo"], lp["ln1_g"], lp["ln1_b"],
                lp["bff1"], lp["bff2"], lp["ln2_g"], lp["ln2_b"]]
        vec_slabs.append(jnp.concatenate([pad_row(r, 3 * h) for r in rows], axis=0))
    vecs = jnp.stack(vec_slabs)                  # (L, 8, 3h)

    emb = params["module_emb"]
    if emb is None:
        emb = jnp.zeros((num_modules, h), jnp.float32)
    flag = params["message_flag"]
    if flag is None:
        flag = jnp.zeros((h,), jnp.float32)
    extras = jnp.concatenate([emb, flag.reshape(1, h)], axis=0)   # (k+1, h)

    return dict(wqkv=stack("wqkv"), wo=stack("wo"),
                wff1=stack("wff1"), wff2=stack("wff2"),
                vecs=vecs, extras=extras)


# -------------------------------------------------------------------------- forward wrapper
def permuted_encoder_forward(modules, packed, cfg, *, num_blocks=1):
    """num_blocks=1 (default): single grid step — best on single-TC v5e/v6e and at toy sizes.
    num_blocks=2 can shard the batch across v7x's two TensorCores once per-step compute
    clearly exceeds the ~0.35 us per-step pipeline overhead."""
    b, k, h = modules.shape
    d_head = h // cfg.num_heads
    scale = 1.0 / (h ** d_head)            # matches torch buffer `_scale`
    num_layers = packed["wqkv"].shape[0]

    assert b % num_blocks == 0
    batch_block = b // num_blocks

    def full(arr):
        n = arr.ndim
        # block == full array, so the constant block index (0,...,0) is exact (not tiled).
        return pl.BlockSpec(arr.shape, lambda i, _n=n: (0,) * _n)

    weights = (packed["extras"], packed["vecs"], packed["wqkv"], packed["wo"],
               packed["wff1"], packed["wff2"])

    kernel = functools.partial(
        _fused_encoder_kernel, num_layers=num_layers, n_head=cfg.num_heads,
        d_head=d_head, scale=scale, prenorm=cfg.prenorm)

    return pl.pallas_call(
        kernel,
        grid=(num_blocks,),
        in_specs=[pl.BlockSpec((batch_block, k, h), lambda i: (i, 0, 0))]
                 + [full(w) for w in weights],
        out_specs=pl.BlockSpec((batch_block, k, h), lambda i: (i, 0, 0)),
        out_shape=jax.ShapeDtypeStruct((b, k, h), modules.dtype),
        compiler_params=pltpu.CompilerParams(dimension_semantics=("parallel",)),
    )(modules, *weights)


# ----------------------------------------------------------------------- parameter init
def init_params(key, hidden, cfg, num_tasks):
    def linear(k_, fan_in, fan_out):
        kw, kb = jax.random.split(k_)
        bound = 1.0 / (fan_in ** 0.5)
        # stored as (in, out) so the kernel computes x @ W (== torch x @ W.T semantics)
        w = jax.random.uniform(kw, (fan_in, fan_out), jnp.float32, -bound, bound)
        bv = jax.random.uniform(kb, (1, fan_out), jnp.float32, -bound, bound)
        return w, bv

    keys = jax.random.split(key, cfg.num_layers + 2)
    layers = []
    for li in range(cfg.num_layers):
        lk = jax.random.split(keys[li], 4)
        wqkv, bqkv = linear(lk[0], hidden, 3 * hidden)
        wo, bo = linear(lk[1], hidden, hidden)
        wff1, bff1 = linear(lk[2], hidden, 2 * hidden)
        wff2, bff2 = linear(lk[3], 2 * hidden, hidden)
        layers.append(dict(
            wqkv=wqkv, bqkv=bqkv, wo=wo, bo=bo,
            wff1=wff1, bff1=bff1, wff2=wff2, bff2=bff2,
            ln1_g=jnp.ones((1, hidden), jnp.float32), ln1_b=jnp.zeros((1, hidden), jnp.float32),
            ln2_g=jnp.ones((1, hidden), jnp.float32), ln2_b=jnp.zeros((1, hidden), jnp.float32)))

    module_emb = None
    if cfg.embed_module:
        table = 0.1 * jax.random.normal(keys[-2], (num_tasks + 1, hidden), jnp.float32)
        module_emb = table[:num_tasks]            # rows for _module_ids = arange(num_tasks)

    message_flag = None
    if cfg.embed_message_flag:
        # torch __init__ uses zeros; a small random value exercises the add path.
        message_flag = 0.1 * jax.random.normal(keys[-1], (hidden,), jnp.float32)

    return dict(layers=layers, module_emb=module_emb, message_flag=message_flag)


# -------------------------------------------------------------------- pure-JAX reference
def _ref_ln(y, g, bta, eps=1e-5):
    mu = jnp.mean(y, -1, keepdims=True)
    var = jnp.mean((y - mu) ** 2, -1, keepdims=True)
    return (y - mu) * lax.rsqrt(var + eps) * g + bta


def _ref_layer(x, p, n_head, prenorm, scale):
    t, n, h = x.shape
    d = h // n_head
    residual = x
    xin = _ref_ln(x, p["ln1_g"][0], p["ln1_b"][0]) if prenorm else x
    qkv = xin @ p["wqkv"] + p["bqkv"][0]
    q, kk, v = jnp.split(qkv, 3, axis=2)
    q = q.reshape(t, n, n_head, d)
    kk = kk.reshape(t, n, n_head, d)
    v = v.reshape(t, n, n_head, d)
    logits = jnp.einsum("ibhd,jbhd->ijbh", q, kk)
    probs = jax.nn.softmax(logits * scale, axis=1)
    attn = jnp.einsum("ijbh,jbhd->ibhd", probs, v).reshape(t, n, h)
    attn = attn @ p["wo"] + p["bo"][0]
    x = residual + attn
    if not prenorm:
        x = _ref_ln(x, p["ln1_g"][0], p["ln1_b"][0])
    residual = x
    xin = _ref_ln(x, p["ln2_g"][0], p["ln2_b"][0]) if prenorm else x
    ff = jax.nn.relu(xin @ p["wff1"] + p["bff1"][0]) @ p["wff2"] + p["bff2"][0]
    x = residual + ff
    if not prenorm:
        x = _ref_ln(x, p["ln2_g"][0], p["ln2_b"][0])
    return x


def reference_forward(modules, params, cfg):
    b, k, h = modules.shape
    d_head = h // cfg.num_heads
    scale = 1.0 / (h ** d_head)
    x = jnp.transpose(modules, (1, 0, 2))                    # (k, b, h), like torch
    if params["module_emb"] is not None:
        x = x + params["module_emb"][:, None, :]
    for lp in params["layers"]:
        x = _ref_layer(x, lp, cfg.num_heads, cfg.prenorm, scale)
    result = jnp.transpose(x, (1, 0, 2))
    if params["message_flag"] is not None:
        result = result + params["message_flag"].reshape(1, 1, h)
    return result


# ------------------------------------------------------------------------------- main
if __name__ == "__main__":
    cfg = Config()
    batch, k_modules, hidden = 2, 8, 32
    num_tasks = k_modules

    key = jax.random.PRNGKey(0)
    k_params, k_x = jax.random.split(key)
    params = init_params(k_params, hidden, cfg, num_tasks)
    packed = prepare_params(params, cfg, hidden, k_modules)   # packed ONCE, outside fwd path
    modules = jax.random.normal(k_x, (batch, k_modules, hidden), jnp.float32)

    out = permuted_encoder_forward(modules, packed, cfg)
    out = jax.block_until_ready(out)

    ref = reference_forward(modules, params, cfg)
    assert out.shape == (batch, k_modules, hidden)
    max_err = float(jnp.max(jnp.abs(out - ref)))
    assert jnp.allclose(out, ref, atol=1e-3, rtol=1e-3), f"max_err={max_err}"

    print("KERNEL_OK")
</pallas_src>

<mosaic_0001>
module attributes {stable_mosaic.version = 11 : i64} {
  func.func @_fused_encoder_kernel(%arg0: i32, %arg1: memref<2x8x32xf32, #tpu.memory_space<vmem>>, %arg2: memref<9x32xf32, #tpu.memory_space<vmem>>, %arg3: memref<2x8x96xf32, #tpu.memory_space<vmem>>, %arg4: memref<2x32x96xf32, #tpu.memory_space<vmem>>, %arg5: memref<2x32x32xf32, #tpu.memory_space<vmem>>, %arg6: memref<2x32x64xf32, #tpu.memory_space<vmem>>, %arg7: memref<2x64x32xf32, #tpu.memory_space<vmem>>, %arg8: memref<2x8x32xf32, #tpu.memory_space<vmem>>) attributes {dimension_semantics = [#tpu.dimension_semantics<parallel>], iteration_bounds = array<i64: 1>, scalar_prefetch = 0 : i64, scratch_operands = 0 : i64, tpu.core_type = #tpu.core_type<tc>, window_params = [{transform_indices = @transform_0, window_bounds = array<i64: 2, 8, 32>}, {pipeline_mode = #tpu.pipeline_mode<synchronous>, transform_indices = @transform_1, window_bounds = array<i64: 9, 32>}, {pipeline_mode = #tpu.pipeline_mode<synchronous>, transform_indices = @transform_2, window_bounds = array<i64: 2, 8, 96>}, {pipeline_mode = #tpu.pipeline_mode<synchronous>, transform_indices = @transform_3, window_bounds = array<i64: 2, 32, 96>}, {pipeline_mode = #tpu.pipeline_mode<synchronous>, transform_indices = @transform_4, window_bounds = array<i64: 2, 32, 32>}, {pipeline_mode = #tpu.pipeline_mode<synchronous>, transform_indices = @transform_5, window_bounds = array<i64: 2, 32, 64>}, {pipeline_mode = #tpu.pipeline_mode<synchronous>, transform_indices = @transform_6, window_bounds = array<i64: 2, 64, 32>}, {transform_indices = @transform_7, window_bounds = array<i64: 2, 8, 32>}]} {
    %c0 = arith.constant 0 : index
    %c0_0 = arith.constant 0 : index
    %0 = vector.load %arg2[%c0, %c0_0] : memref<9x32xf32, #tpu.memory_space<vmem>>, vector<9x32xf32>
    %c0_1 = arith.constant 0 : index
    %c0_2 = arith.constant 0 : index
    %c0_3 = arith.constant 0 : index
    %1 = vector.load %arg1[%c0_1, %c0_2, %c0_3] : memref<2x8x32xf32, #tpu.memory_space<vmem>>, vector<2x8x32xf32>
    %2 = vector.extract_strided_slice %0 {offsets = [0, 0], sizes = [8, 32], strides = [1, 1]} : vector<9x32xf32> to vector<8x32xf32>
    %3 = vector.shape_cast %2 : vector<8x32xf32> to vector<1x8x32xf32>
    %4 = vector.broadcast %3 : vector<1x8x32xf32> to vector<2x8x32xf32>
    %5 = arith.addf %1, %4 : vector<2x8x32xf32>
    %6 = vector.shape_cast %5 : vector<2x8x32xf32> to vector<16x32xf32>
    %c0_4 = arith.constant 0 : index
    %c0_5 = arith.constant 0 : index
    %c0_6 = arith.constant 0 : index
    %7 = vector.load %arg4[%c0_4, %c0_5, %c0_6] : memref<2x32x96xf32, #tpu.memory_space<vmem>>, vector<1x32x96xf32>
    %8 = vector.shape_cast %7 : vector<1x32x96xf32> to vector<32x96xf32>
    %c0_7 = arith.constant 0 : index
    %c0_8 = arith.constant 0 : index
    %c0_9 = arith.constant 0 : index
    %9 = vector.load %arg5[%c0_7, %c0_8, %c0_9] : memref<2x32x32xf32, #tpu.memory_space<vmem>>, vector<1x32x32xf32>
    %10 = vector.shape_cast %9 : vector<1x32x32xf32> to vector<32x32xf32>
    %c0_10 = arith.constant 0 : index
    %c0_11 = arith.constant 0 : index
    %c0_12 = arith.constant 0 : index
    %11 = vector.load %arg6[%c0_10, %c0_11, %c0_12] : memref<2x32x64xf32, #tpu.memory_space<vmem>>, vector<1x32x64xf32>
    %12 = vector.shape_cast %11 : vector<1x32x64xf32> to vector<32x64xf32>
    %c0_13 = arith.constant 0 : index
    %c0_14 = arith.constant 0 : index
    %c0_15 = arith.constant 0 : index
    %13 = vector.load %arg7[%c0_13, %c0_14, %c0_15] : memref<2x64x32xf32, #tpu.memory_space<vmem>>, vector<1x64x32xf32>
    %14 = vector.shape_cast %13 : vector<1x64x32xf32> to vector<64x32xf32>
    %c0_16 = arith.constant 0 : index
    %c0_17 = arith.constant 0 : index
    %c0_18 = arith.constant 0 : index
    %15 = vector.load %arg3[%c0_16, %c0_17, %c0_18] : memref<2x8x96xf32, #tpu.memory_space<vmem>>, vector<1x8x96xf32>
    %16 = vector.shape_cast %15 : vector<1x8x96xf32> to vector<8x96xf32>
    %17 = vector.extract_strided_slice %16 {offsets = [0, 0], sizes = [1, 96], strides = [1, 1]} : vector<8x96xf32> to vector<1x96xf32>
    %18 = vector.extract_strided_slice %16 {offsets = [1, 0], sizes = [1, 32], strides = [1, 1]} : vector<8x96xf32> to vector<1x32xf32>
    %19 = vector.extract_strided_slice %16 {offsets = [2, 0], sizes = [1, 32], strides = [1, 1]} : vector<8x96xf32> to vector<1x32xf32>
    %20 = vector.extract_strided_slice %16 {offsets = [3, 0], sizes = [1, 32], strides = [1, 1]} : vector<8x96xf32> to vector<1x32xf32>
    %21 = vector.extract_strided_slice %16 {offsets = [4, 0], sizes = [1, 64], strides = [1, 1]} : vector<8x96xf32> to vector<1x64xf32>
    %22 = vector.extract_strided_slice %16 {offsets = [5, 0], sizes = [1, 32], strides = [1, 1]} : vector<8x96xf32> to vector<1x32xf32>
    %23 = vector.extract_strided_slice %16 {offsets = [6, 0], sizes = [1, 32], strides = [1, 1]} : vector<8x96xf32> to vector<1x32xf32>
    %24 = vector.extract_strided_slice %16 {offsets = [7, 0], sizes = [1, 32], strides = [1, 1]} : vector<8x96xf32> to vector<1x32xf32>
    %cst = arith.constant dense<0.000000e+00> : vector<16xf32>
    %25 = vector.multi_reduction <add>, %6, %cst [1] : vector<16x32xf32> to vector<16xf32>
    %26 = vector.shape_cast %25 : vector<16xf32> to vector<16x1xf32>
    %cst_19 = arith.constant 3.200000e+01 : f32
    %27 = vector.broadcast %cst_19 : f32 to vector<16x1xf32>
    %28 = arith.divf %26, %27 : vector<16x1xf32>
    %29 = vector.broadcast %28 : vector<16x1xf32> to vector<16x32xf32>
    %30 = arith.subf %6, %29 : vector<16x32xf32>
    %31 = arith.mulf %30, %30 : vector<16x32xf32>
    %cst_20 = arith.constant dense<0.000000e+00> : vector<16xf32>
    %32 = vector.multi_reduction <add>, %31, %cst_20 [1] : vector<16x32xf32> to vector<16xf32>
    %33 = vector.shape_cast %32 : vector<16xf32> to vector<16x1xf32>
    %cst_21 = arith.constant 3.200000e+01 : f32
    %34 = vector.broadcast %cst_21 : f32 to vector<16x1xf32>
    %35 = arith.divf %33, %34 : vector<16x1xf32>
    %36 = vector.broadcast %28 : vector<16x1xf32> to vector<16x32xf32>
    %37 = arith.subf %6, %36 : vector<16x32xf32>
    %cst_22 = arith.constant 9.99999974E-6 : f32
    %38 = vector.broadcast %cst_22 : f32 to vector<16x1xf32>
    %39 = arith.addf %35, %38 : vector<16x1xf32>
    %40 = math.rsqrt %39 : vector<16x1xf32>
    %41 = vector.broadcast %40 : vector<16x1xf32> to vector<16x32xf32>
    %42 = arith.mulf %37, %41 : vector<16x32xf32>
    %43 = vector.broadcast %19 : vector<1x32xf32> to vector<16x32xf32>
    %44 = arith.mulf %42, %43 : vector<16x32xf32>
    %45 = vector.broadcast %20 : vector<1x32xf32> to vector<16x32xf32>
    %46 = arith.addf %44, %45 : vector<16x32xf32>
    %cst_23 = arith.constant dense<0.000000e+00> : vector<16x96xf32>
    %47 = tpu.matmul %46, %8, %cst_23 {dimension_numbers = #tpu.dot_dimension_numbers<[1], [0], [0], [1], [0, 0, 1, 1], [], []>} : vector<16x32xf32>, vector<32x96xf32>, vector<16x96xf32> -> vector<16x96xf32>
    %48 = vector.broadcast %17 : vector<1x96xf32> to vector<16x96xf32>
    %49 = arith.addf %47, %48 : vector<16x96xf32>
    %50 = vector.extract_strided_slice %49 {offsets = [0, 0], sizes = [16, 8], strides = [1, 1]} : vector<16x96xf32> to vector<16x8xf32>
    %51 = vector.shape_cast %50 : vector<16x8xf32> to vector<2x8x8xf32>
    %52 = vector.extract_strided_slice %49 {offsets = [0, 32], sizes = [16, 8], strides = [1, 1]} : vector<16x96xf32> to vector<16x8xf32>
    %53 = vector.shape_cast %52 : vector<16x8xf32> to vector<2x8x8xf32>
    %54 = vector.extract_strided_slice %49 {offsets = [0, 64], sizes = [16, 8], strides = [1, 1]} : vector<16x96xf32> to vector<16x8xf32>
    %55 = vector.shape_cast %54 : vector<16x8xf32> to vector<2x8x8xf32>
    "tpu.trace_start"() <{level = 10 : i32, message = "bqd,bkd->bqk"}> : () -> ()
    %cst_24 = arith.constant dense<0.000000e+00> : vector<2x8x8xf32>
    %56 = tpu.matmul %51, %53, %cst_24 {dimension_numbers = #tpu.dot_dimension_numbers<[2], [2], [1], [1], [0, 0, 0, 1, 1, 1], [0], [0]>} : vector<2x8x8xf32>, vector<2x8x8xf32>, vector<2x8x8xf32> -> vector<2x8x8xf32>
    "tpu.trace_stop"() : () -> ()
    %cst_25 = arith.constant 9.09494702E-13 : f32
    %57 = vector.broadcast %cst_25 : f32 to vector<2x8x8xf32>
    %58 = arith.mulf %56, %57 : vector<2x8x8xf32>
    %59 = math.exp %58 : vector<2x8x8xf32>
    %cst_26 = arith.constant dense<0.000000e+00> : vector<2x8xf32>
    %60 = vector.multi_reduction <add>, %59, %cst_26 [2] : vector<2x8x8xf32> to vector<2x8xf32>
    %61 = vector.shape_cast %60 : vector<2x8xf32> to vector<2x8x1xf32>
    %62 = vector.broadcast %61 : vector<2x8x1xf32> to vector<2x8x8xf32>
    %63 = arith.divf %59, %62 : vector<2x8x8xf32>
    "tpu.trace_start"() <{level = 10 : i32, message = "bqk,bkd->bqd"}> : () -> ()
    %cst_27 = arith.constant dense<0.000000e+00> : vector<2x8x8xf32>
    %64 = tpu.matmul %63, %55, %cst_27 {dimension_numbers = #tpu.dot_dimension_numbers<[2], [1], [1], [2], [0, 0, 0, 1, 1, 2], [0], [0]>} : vector<2x8x8xf32>, vector<2x8x8xf32>, vector<2x8x8xf32> -> vector<2x8x8xf32>
    "tpu.trace_stop"() : () -> ()
    %65 = vector.extract_strided_slice %49 {offsets = [0, 8], sizes = [16, 8], strides = [1, 1]} : vector<16x96xf32> to vector<16x8xf32>
    %66 = vector.shape_cast %65 : vector<16x8xf32> to vector<2x8x8xf32>
    %67 = vector.extract_strided_slice %49 {offsets = [0, 40], sizes = [16, 8], strides = [1, 1]} : vector<16x96xf32> to vector<16x8xf32>
    %68 = vector.shape_cast %67 : vector<16x8xf32> to vector<2x8x8xf32>
    %69 = vector.extract_strided_slice %49 {offsets = [0, 72], sizes = [16, 8], strides = [1, 1]} : vector<16x96xf32> to vector<16x8xf32>
    %70 = vector.shape_cast %69 : vector<16x8xf32> to vector<2x8x8xf32>
    "tpu.trace_start"() <{level = 10 : i32, message = "bqd,bkd->bqk"}> : () -> ()
    %cst_28 = arith.constant dense<0.000000e+00> : vector<2x8x8xf32>
    %71 = tpu.matmul %66, %68, %cst_28 {dimension_numbers = #tpu.dot_dimension_numbers<[2], [2], [1], [1], [0, 0, 0, 1, 1, 1], [0], [0]>} : vector<2x8x8xf32>, vector<2x8x8xf32>, vector<2x8x8xf32> -> vector<2x8x8xf32>
    "tpu.trace_stop"() : () -> ()
    %cst_29 = arith.constant 9.09494702E-13 : f32
    %72 = vector.broadcast %cst_29 : f32 to vector<2x8x8xf32>
    %73 = arith.mulf %71, %72 : vector<2x8x8xf32>
    %74 = math.exp %73 : vector<2x8x8xf32>
    %cst_30 = arith.constant dense<0.000000e+00> : vector<2x8xf32>
    %75 = vector.multi_reduction <add>, %74, %cst_30 [2] : vector<2x8x8xf32> to vector<2x8xf32>
    %76 = vector.shape_cast %75 : vector<2x8xf32> to vector<2x8x1xf32>
    %77 = vector.broadcast %76 : vector<2x8x1xf32> to vector<2x8x8xf32>
    %78 = arith.divf %74, %77 : vector<2x8x8xf32>
    "tpu.trace_start"() <{level = 10 : i32, message = "bqk,bkd->bqd"}> : () -> ()
    %cst_31 = arith.constant dense<0.000000e+00> : vector<2x8x8xf32>
    %79 = tpu.matmul %78, %70, %cst_31 {dimension_numbers = #tpu.dot_dimension_numbers<[2], [1], [1], [2], [0, 0, 0, 1, 1, 2], [0], [0]>} : vector<2x8x8xf32>, vector<2x8x8xf32>, vector<2x8x8xf32> -> vector<2x8x8xf32>
    "tpu.trace_stop"() : () -> ()
    %80 = vector.extract_strided_slice %49 {offsets = [0, 16], sizes = [16, 8], strides = [1, 1]} : vector<16x96xf32> to vector<16x8xf32>
    %81 = vector.shape_cast %80 : vector<16x8xf32> to vector<2x8x8xf32>
    %82 = vector.extract_strided_slice %49 {offsets = [0, 48], sizes = [16, 8], strides = [1, 1]} : vector<16x96xf32> to vector<16x8xf32>
    %83 = vector.shape_cast %82 : vector<16x8xf32> to vector<2x8x8xf32>
    %84 = vector.extract_strided_slice %49 {offsets = [0, 80], sizes = [16, 8], strides = [1, 1]} : vector<16x96xf32> to vector<16x8xf32>
    %85 = vector.shape_cast %84 : vector<16x8xf32> to vector<2x8x8xf32>
    "tpu.trace_start"() <{level = 10 : i32, message = "bqd,bkd->bqk"}> : () -> ()
    %cst_32 = arith.constant dense<0.000000e+00> : vector<2x8x8xf32>
    %86 = tpu.matmul %81, %83, %cst_32 {dimension_numbers = #tpu.dot_dimension_numbers<[2], [2], [1], [1], [0, 0, 0, 1, 1, 1], [0], [0]>} : vector<2x8x8xf32>, vector<2x8x8xf32>, vector<2x8x8xf32> -> vector<2x8x8xf32>
    "tpu.trace_stop"() : () -> ()
    %cst_33 = arith.constant 9.09494702E-13 : f32
    %87 = vector.broadcast %cst_33 : f32 to vector<2x8x8xf32>
    %88 = arith.mulf %86, %87 : vector<2x8x8xf32>
    %89 = math.exp %88 : vector<2x8x8xf32>
    %cst_34 = arith.constant dense<0.000000e+00> : vector<2x8xf32>
    %90 = vector.multi_reduction <add>, %89, %cst_34 [2] : vector<2x8x8xf32> to vector<2x8xf32>
    %91 = vector.shape_cast %90 : vector<2x8xf32> to vector<2x8x1xf32>
    %92 = vector.broadcast %91 : vector<2x8x1xf32> to vector<2x8x8xf32>
    %93 = arith.divf %89, %92 : vector<2x8x8xf32>
    "tpu.trace_start"() <{level = 10 : i32, message = "bqk,bkd->bqd"}> : () -> ()
    %cst_35 = arith.constant dense<0.000000e+00> : vector<2x8x8xf32>
    %94 = tpu.matmul %93, %85, %cst_35 {dimension_numbers = #tpu.dot_dimension_numbers<[2], [1], [1], [2], [0, 0, 0, 1, 1, 2], [0], [0]>} : vector<2x8x8xf32>, vector<2x8x8xf32>, vector<2x8x8xf32> -> vector<2x8x8xf32>
    "tpu.trace_stop"() : () -> ()
    %95 = vector.extract_strided_slice %49 {offsets = [0, 24], sizes = [16, 8], strides = [1, 1]} : vector<16x96xf32> to vector<16x8xf32>
    %96 = vector.shape_cast %95 : vector<16x8xf32> to vector<2x8x8xf32>
    %97 = vector.extract_strided_slice %49 {offsets = [0, 56], sizes = [16, 8], strides = [1, 1]} : vector<16x96xf32> to vector<16x8xf32>
    %98 = vector.shape_cast %97 : vector<16x8xf32> to vector<2x8x8xf32>
    %99 = vector.extract_strided_slice %49 {offsets = [0, 88], sizes = [16, 8], strides = [1, 1]} : vector<16x96xf32> to vector<16x8xf32>
    %100 = vector.shape_cast %99 : vector<16x8xf32> to vector<2x8x8xf32>
    "tpu.trace_start"() <{level = 10 : i32, message = "bqd,bkd->bqk"}> : () -> ()
    %cst_36 = arith.constant dense<0.000000e+00> : vector<2x8x8xf32>
    %101 = tpu.matmul %96, %98, %cst_36 {dimension_numbers = #tpu.dot_dimension_numbers<[2], [2], [1], [1], [0, 0, 0, 1, 1, 1], [0], [0]>} : vector<2x8x8xf32>, vector<2x8x8xf32>, vector<2x8x8xf32> -> vector<2x8x8xf32>
    "tpu.trace_stop"() : () -> ()
    %cst_37 = arith.constant 9.09494702E-13 : f32
    %102 = vector.broadcast %cst_37 : f32 to vector<2x8x8xf32>
    %103 = arith.mulf %101, %102 : vector<2x8x8xf32>
    %104 = math.exp %103 : vector<2x8x8xf32>
    %cst_38 = arith.constant dense<0.000000e+00> : vector<2x8xf32>
    %105 = vector.multi_reduction <add>, %104, %cst_38 [2] : vector<2x8x8xf32> to vector<2x8xf32>
    %106 = vector.shape_cast %105 : vector<2x8xf32> to vector<2x8x1xf32>
    %107 = vector.broadcast %106 : vector<2x8x1xf32> to vector<2x8x8xf32>
    %108 = arith.divf %104, %107 : vector<2x8x8xf32>
    "tpu.trace_start"() <{level = 10 : i32, message = "bqk,bkd->bqd"}> : () -> ()
    %cst_39 = arith.constant dense<0.000000e+00> : vector<2x8x8xf32>
    %109 = tpu.matmul %108, %100, %cst_39 {dimension_numbers = #tpu.dot_dimension_numbers<[2], [1], [1], [2], [0, 0, 0, 1, 1, 2], [0], [0]>} : vector<2x8x8xf32>, vector<2x8x8xf32>, vector<2x8x8xf32> -> vector<2x8x8xf32>
    "tpu.trace_stop"() : () -> ()
    %110 = tpu.concatenate %64, %79, %94, %109 in 2 : vector<2x8x8xf32>, vector<2x8x8xf32>, vector<2x8x8xf32>, vector<2x8x8xf32> -> vector<2x8x32xf32>
    %111 = vector.shape_cast %110 : vector<2x8x32xf32> to vector<16x32xf32>
    %cst_40 = arith.constant dense<0.000000e+00> : vector<16x32xf32>
    %112 = tpu.matmul %111, %10, %cst_40 {dimension_numbers = #tpu.dot_dimension_numbers<[1], [0], [0], [1], [0, 0, 1, 1], [], []>} : vector<16x32xf32>, vector<32x32xf32>, vector<16x32xf32> -> vector<16x32xf32>
    %113 = vector.broadcast %18 : vector<1x32xf32> to vector<16x32xf32>
    %114 = arith.addf %112, %113 : vector<16x32xf32>
    %115 = arith.addf %6, %114 : vector<16x32xf32>
    %cst_41 = arith.constant dense<0.000000e+00> : vector<16xf32>
    %116 = vector.multi_reduction <add>, %115, %cst_41 [1] : vector<16x32xf32> to vector<16xf32>
    %117 = vector.shape_cast %116 : vector<16xf32> to vector<16x1xf32>
    %cst_42 = arith.constant 3.200000e+01 : f32
    %118 = vector.broadcast %cst_42 : f32 to vector<16x1xf32>
    %119 = arith.divf %117, %118 : vector<16x1xf32>
    %120 = vector.broadcast %119 : vector<16x1xf32> to vector<16x32xf32>
    %121 = arith.subf %115, %120 : vector<16x32xf32>
    %122 = arith.mulf %121, %121 : vector<16x32xf32>
    %cst_43 = arith.constant dense<0.000000e+00> : vector<16xf32>
    %123 = vector.multi_reduction <add>, %122, %cst_43 [1] : vector<16x32xf32> to vector<16xf32>
    %124 = vector.shape_cast %123 : vector<16xf32> to vector<16x1xf32>
    %cst_44 = arith.constant 3.200000e+01 : f32
    %125 = vector.broadcast %cst_44 : f32 to vector<16x1xf32>
    %126 = arith.divf %124, %125 : vector<16x1xf32>
    %127 = vector.broadcast %119 : vector<16x1xf32> to vector<16x32xf32>
    %128 = arith.subf %115, %127 : vector<16x32xf32>
    %cst_45 = arith.constant 9.99999974E-6 : f32
    %129 = vector.broadcast %cst_45 : f32 to vector<16x1xf32>
    %130 = arith.addf %126, %129 : vector<16x1xf32>
    %131 = math.rsqrt %130 : vector<16x1xf32>
    %132 = vector.broadcast %131 : vector<16x1xf32> to vector<16x32xf32>
    %133 = arith.mulf %128, %132 : vector<16x32xf32>
    %134 = vector.broadcast %23 : vector<1x32xf32> to vector<16x32xf32>
    %135 = arith.mulf %133, %134 : vector<16x32xf32>
    %136 = vector.broadcast %24 : vector<1x32xf32> to vector<16x32xf32>
    %137 = arith.addf %135, %136 : vector<16x32xf32>
    %cst_46 = arith.constant dense<0.000000e+00> : vector<16x64xf32>
    %138 = tpu.matmul %137, %12, %cst_46 {dimension_numbers = #tpu.dot_dimension_numbers<[1], [0], [0], [1], [0, 0, 1, 1], [], []>} : vector<16x32xf32>, vector<32x64xf32>, vector<16x64xf32> -> vector<16x64xf32>
    %139 = vector.broadcast %21 : vector<1x64xf32> to vector<16x64xf32>
    %140 = arith.addf %138, %139 : vector<16x64xf32>
    %cst_47 = arith.constant 0.000000e+00 : f32
    %141 = vector.broadcast %cst_47 : f32 to vector<16x64xf32>
    %142 = arith.maximumf %140, %141 : vector<16x64xf32>
    %cst_48 = arith.constant dense<0.000000e+00> : vector<16x32xf32>
    %143 = tpu.matmul %142, %14, %cst_48 {dimension_numbers = #tpu.dot_dimension_numbers<[1], [0], [0], [1], [0, 0, 1, 1], [], []>} : vector<16x64xf32>, vector<64x32xf32>, vector<16x32xf32> -> vector<16x32xf32>
    %144 = vector.broadcast %22 : vector<1x32xf32> to vector<16x32xf32>
    %145 = arith.addf %143, %144 : vector<16x32xf32>
    %146 = arith.addf %115, %145 : vector<16x32xf32>
    %c1 = arith.constant 1 : index
    %c0_49 = arith.constant 0 : index
    %c0_50 = arith.constant 0 : index
    %147 = vector.load %arg4[%c1, %c0_49, %c0_50] : memref<2x32x96xf32, #tpu.memory_space<vmem>>, vector<1x32x96xf32>
    %148 = vector.shape_cast %147 : vector<1x32x96xf32> to vector<32x96xf32>
    %c1_51 = arith.constant 1 : index
    %c0_52 = arith.constant 0 : index
    %c0_53 = arith.constant 0 : index
    %149 = vector.load %arg5[%c1_51, %c0_52, %c0_53] : memref<2x32x32xf32, #tpu.memory_space<vmem>>, vector<1x32x32xf32>
    %150 = vector.shape_cast %149 : vector<1x32x32xf32> to vector<32x32xf32>
    %c1_54 = arith.constant 1 : index
    %c0_55 = arith.constant 0 : index
    %c0_56 = arith.constant 0 : index
    %151 = vector.load %arg6[%c1_54, %c0_55, %c0_56] : memref<2x32x64xf32, #tpu.memory_space<vmem>>, vector<1x32x64xf32>
    %152 = vector.shape_cast %151 : vector<1x32x64xf32> to vector<32x64xf32>
    %c1_57 = arith.constant 1 : index
    %c0_58 = arith.constant 0 : index
    %c0_59 = arith.constant 0 : index
    %153 = vector.load %arg7[%c1_57, %c0_58, %c0_59] : memref<2x64x32xf32, #tpu.memory_space<vmem>>, vector<1x64x32xf32>
    %154 = vector.shape_cast %153 : vector<1x64x32xf32> to vector<64x32xf32>
    %c1_60 = arith.constant 1 : index
    %c0_61 = arith.constant 0 : index
    %c0_62 = arith.constant 0 : index
    %155 = vector.load %arg3[%c1_60, %c0_61, %c0_62] : memref<2x8x96xf32, #tpu.memory_space<vmem>>, vector<1x8x96xf32>
    %156 = vector.shape_cast %155 : vector<1x8x96xf32> to vector<8x96xf32>
    %157 = vector.extract_strided_slice %156 {offsets = [0, 0], sizes = [1, 96], strides = [1, 1]} : vector<8x96xf32> to vector<1x96xf32>
    %158 = vector.extract_strided_slice %156 {offsets = [1, 0], sizes = [1, 32], strides = [1, 1]} : vector<8x96xf32> to vector<1x32xf32>
    %159 = vector.extract_strided_slice %156 {offsets = [2, 0], sizes = [1, 32], strides = [1, 1]} : vector<8x96xf32> to vector<1x32xf32>
    %160 = vector.extract_strided_slice %156 {offsets = [3, 0], sizes = [1, 32], strides = [1, 1]} : vector<8x96xf32> to vector<1x32xf32>
    %161 = vector.extract_strided_slice %156 {offsets = [4, 0], sizes = [1, 64], strides = [1, 1]} : vector<8x96xf32> to vector<1x64xf32>
    %162 = vector.extract_strided_slice %156 {offsets = [5, 0], sizes = [1, 32], strides = [1, 1]} : vector<8x96xf32> to vector<1x32xf32>
    %163 = vector.extract_strided_slice %156 {offsets = [6, 0], sizes = [1, 32], strides = [1, 1]} : vector<8x96xf32> to vector<1x32xf32>
    %164 = vector.extract_strided_slice %156 {offsets = [7, 0], sizes = [1, 32], strides = [1, 1]} : vector<8x96xf32> to vector<1x32xf32>
    %cst_63 = arith.constant dense<0.000000e+00> : vector<16xf32>
    %165 = vector.multi_reduction <add>, %146, %cst_63 [1] : vector<16x32xf32> to vector<16xf32>
    %166 = vector.shape_cast %165 : vector<16xf32> to vector<16x1xf32>
    %cst_64 = arith.constant 3.200000e+01 : f32
    %167 = vector.broadcast %cst_64 : f32 to vector<16x1xf32>
    %168 = arith.divf %166, %167 : vector<16x1xf32>
    %169 = vector.broadcast %168 : vector<16x1xf32> to vector<16x32xf32>
    %170 = arith.subf %146, %169 : vector<16x32xf32>
    %171 = arith.mulf %170, %170 : vector<16x32xf32>
    %cst_65 = arith.constant dense<0.000000e+00> : vector<16xf32>
    %172 = vector.multi_reduction <add>, %171, %cst_65 [1] : vector<16x32xf32> to vector<16xf32>
    %173 = vector.shape_cast %172 : vector<16xf32> to vector<16x1xf32>
    %cst_66 = arith.constant 3.200000e+01 : f32
    %174 = vector.broadcast %cst_66 : f32 to vector<16x1xf32>
    %175 = arith.divf %173, %174 : vector<16x1xf32>
    %176 = vector.broadcast %168 : vector<16x1xf32> to vector<16x32xf32>
    %177 = arith.subf %146, %176 : vector<16x32xf32>
    %cst_67 = arith.constant 9.99999974E-6 : f32
    %178 = vector.broadcast %cst_67 : f32 to vector<16x1xf32>
    %179 = arith.addf %175, %178 : vector<16x1xf32>
    %180 = math.rsqrt %179 : vector<16x1xf32>
    %181 = vector.broadcast %180 : vector<16x1xf32> to vector<16x32xf32>
    %182 = arith.mulf %177, %181 : vector<16x32xf32>
    %183 = vector.broadcast %159 : vector<1x32xf32> to vector<16x32xf32>
    %184 = arith.mulf %182, %183 : vector<16x32xf32>
    %185 = vector.broadcast %160 : vector<1x32xf32> to vector<16x32xf32>
    %186 = arith.addf %184, %185 : vector<16x32xf32>
    %cst_68 = arith.constant dense<0.000000e+00> : vector<16x96xf32>
    %187 = tpu.matmul %186, %148, %cst_68 {dimension_numbers = #tpu.dot_dimension_numbers<[1], [0], [0], [1], [0, 0, 1, 1], [], []>} : vector<16x32xf32>, vector<32x96xf32>, vector<16x96xf32> -> vector<16x96xf32>
    %188 = vector.broadcast %157 : vector<1x96xf32> to vector<16x96xf32>
    %189 = arith.addf %187, %188 : vector<16x96xf32>
    %190 = vector.extract_strided_slice %189 {offsets = [0, 0], sizes = [16, 8], strides = [1, 1]} : vector<16x96xf32> to vector<16x8xf32>
    %191 = vector.shape_cast %190 : vector<16x8xf32> to vector<2x8x8xf32>
    %192 = vector.extract_strided_slice %189 {offsets = [0, 32], sizes = [16, 8], strides = [1, 1]} : vector<16x96xf32> to vector<16x8xf32>
    %193 = vector.shape_cast %192 : vector<16x8xf32> to vector<2x8x8xf32>
    %194 = vector.extract_strided_slice %189 {offsets = [0, 64], sizes = [16, 8], strides = [1, 1]} : vector<16x96xf32> to vector<16x8xf32>
    %195 = vector.shape_cast %194 : vector<16x8xf32> to vector<2x8x8xf32>
    "tpu.trace_start"() <{level = 10 : i32, message = "bqd,bkd->bqk"}> : () -> ()
    %cst_69 = arith.constant dense<0.000000e+00> : vector<2x8x8xf32>
    %196 = tpu.matmul %191, %193, %cst_69 {dimension_numbers = #tpu.dot_dimension_numbers<[2], [2], [1], [1], [0, 0, 0, 1, 1, 1], [0], [0]>} : vector<2x8x8xf32>, vector<2x8x8xf32>, vector<2x8x8xf32> -> vector<2x8x8xf32>
    "tpu.trace_stop"() : () -> ()
    %cst_70 = arith.constant 9.09494702E-13 : f32
    %197 = vector.broadcast %cst_70 : f32 to vector<2x8x8xf32>
    %198 = arith.mulf %196, %197 : vector<2x8x8xf32>
    %199 = math.exp %198 : vector<2x8x8xf32>
    %cst_71 = arith.constant dense<0.000000e+00> : vector<2x8xf32>
    %200 = vector.multi_reduction <add>, %199, %cst_71 [2] : vector<2x8x8xf32> to vector<2x8xf32>
    %201 = vector.shape_cast %200 : vector<2x8xf32> to vector<2x8x1xf32>
    %202 = vector.broadcast %201 : vector<2x8x1xf32> to vector<2x8x8xf32>
    %203 = arith.divf %199, %202 : vector<2x8x8xf32>
    "tpu.trace_start"() <{level = 10 : i32, message = "bqk,bkd->bqd"}> : () -> ()
    %cst_72 = arith.constant dense<0.000000e+00> : vector<2x8x8xf32>
    %204 = tpu.matmul %203, %195, %cst_72 {dimension_numbers = #tpu.dot_dimension_numbers<[2], [1], [1], [2], [0, 0, 0, 1, 1, 2], [0], [0]>} : vector<2x8x8xf32>, vector<2x8x8xf32>, vector<2x8x8xf32> -> vector<2x8x8xf32>
    "tpu.trace_stop"() : () -> ()
    %205 = vector.extract_strided_slice %189 {offsets = [0, 8], sizes = [16, 8], strides = [1, 1]} : vector<16x96xf32> to vector<16x8xf32>
    %206 = vector.shape_cast %205 : vector<16x8xf32> to vector<2x8x8xf32>
    %207 = vector.extract_strided_slice %189 {offsets = [0, 40], sizes = [16, 8], strides = [1, 1]} : vector<16x96xf32> to vector<16x8xf32>
    %208 = vector.shape_cast %207 : vector<16x8xf32> to vector<2x8x8xf32>
    %209 = vector.extract_strided_slice %189 {offsets = [0, 72], sizes = [16, 8], strides = [1, 1]} : vector<16x96xf32> to vector<16x8xf32>
    %210 = vector.shape_cast %209 : vector<16x8xf32> to vector<2x8x8xf32>
    "tpu.trace_start"() <{level = 10 : i32, message = "bqd,bkd->bqk"}> : () -> ()
    %cst_73 = arith.constant dense<0.000000e+00> : vector<2x8x8xf32>
    %211 = tpu.matmul %206, %208, %cst_73 {dimension_numbers = #tpu.dot_dimension_numbers<[2], [2], [1], [1], [0, 0, 0, 1, 1, 1], [0], [0]>} : vector<2x8x8xf32>, vector<2x8x8xf32>, vector<2x8x8xf32> -> vector<2x8x8xf32>
    "tpu.trace_stop"() : () -> ()
    %cst_74 = arith.constant 9.09494702E-13 : f32
    %212 = vector.broadcast %cst_74 : f32 to vector<2x8x8xf32>
    %213 = arith.mulf %211, %212 : vector<2x8x8xf32>
    %214 = math.exp %213 : vector<2x8x8xf32>
    %cst_75 = arith.constant dense<0.000000e+00> : vector<2x8xf32>
    %215 = vector.multi_reduction <add>, %214, %cst_75 [2] : vector<2x8x8xf32> to vector<2x8xf32>
    %216 = vector.shape_cast %215 : vector<2x8xf32> to vector<2x8x1xf32>
    %217 = vector.broadcast %216 : vector<2x8x1xf32> to vector<2x8x8xf32>
    %218 = arith.divf %214, %217 : vector<2x8x8xf32>
    "tpu.trace_start"() <{level = 10 : i32, message = "bqk,bkd->bqd"}> : () -> ()
    %cst_76 = arith.constant dense<0.000000e+00> : vector<2x8x8xf32>
    %219 = tpu.matmul %218, %210, %cst_76 {dimension_numbers = #tpu.dot_dimension_numbers<[2], [1], [1], [2], [0, 0, 0, 1, 1, 2], [0], [0]>} : vector<2x8x8xf32>, vector<2x8x8xf32>, vector<2x8x8xf32> -> vector<2x8x8xf32>
    "tpu.trace_stop"() : () -> ()
    %220 = vector.extract_strided_slice %189 {offsets = [0, 16], sizes = [16, 8], strides = [1, 1]} : vector<16x96xf32> to vector<16x8xf32>
    %221 = vector.shape_cast %220 : vector<16x8xf32> to vector<2x8x8xf32>
    %222 = vector.extract_strided_slice %189 {offsets = [0, 48], sizes = [16, 8], strides = [1, 1]} : vector<16x96xf32> to vector<16x8xf32>
    %223 = vector.shape_cast %222 : vector<16x8xf32> to vector<2x8x8xf32>
    %224 = vector.extract_strided_slice %189 {offsets = [0, 80], sizes = [16, 8], strides = [1, 1]} : vector<16x96xf32> to vector<16x8xf32>
    %225 = vector.shape_cast %224 : vector<16x8xf32> to vector<2x8x8xf32>
    "tpu.trace_start"() <{level = 10 : i32, message = "bqd,bkd->bqk"}> : () -> ()
    %cst_77 = arith.constant dense<0.000000e+00> : vector<2x8x8xf32>
    %226 = tpu.matmul %221, %223, %cst_77 {dimension_numbers = #tpu.dot_dimension_numbers<[2], [2], [1], [1], [0, 0, 0, 1, 1, 1], [0], [0]>} : vector<2x8x8xf32>, vector<2x8x8xf32>, vector<2x8x8xf32> -> vector<2x8x8xf32>
    "tpu.trace_stop"() : () -> ()
    %cst_78 = arith.constant 9.09494702E-13 : f32
    %227 = vector.broadcast %cst_78 : f32 to vector<2x8x8xf32>
    %228 = arith.mulf %226, %227 : vector<2x8x8xf32>
    %229 = math.exp %228 : vector<2x8x8xf32>
    %cst_79 = arith.constant dense<0.000000e+00> : vector<2x8xf32>
    %230 = vector.multi_reduction <add>, %229, %cst_79 [2] : vector<2x8x8xf32> to vector<2x8xf32>
    %231 = vector.shape_cast %230 : vector<2x8xf32> to vector<2x8x1xf32>
    %232 = vector.broadcast %231 : vector<2x8x1xf32> to vector<2x8x8xf32>
    %233 = arith.divf %229, %232 : vector<2x8x8xf32>
    "tpu.trace_start"() <{level = 10 : i32, message = "bqk,bkd->bqd"}> : () -> ()
    %cst_80 = arith.constant dense<0.000000e+00> : vector<2x8x8xf32>
    %234 = tpu.matmul %233, %225, %cst_80 {dimension_numbers = #tpu.dot_dimension_numbers<[2], [1], [1], [2], [0, 0, 0, 1, 1, 2], [0], [0]>} : vector<2x8x8xf32>, vector<2x8x8xf32>, vector<2x8x8xf32> -> vector<2x8x8xf32>
    "tpu.trace_stop"() : () -> ()
    %235 = vector.extract_strided_slice %189 {offsets = [0, 24], sizes = [16, 8], strides = [1, 1]} : vector<16x96xf32> to vector<16x8xf32>
    %236 = vector.shape_cast %235 : vector<16x8xf32> to vector<2x8x8xf32>
    %237 = vector.extract_strided_slice %189 {offsets = [0, 56], sizes = [16, 8], strides = [1, 1]} : vector<16x96xf32> to vector<16x8xf32>
    %238 = vector.shape_cast %237 : vector<16x8xf32> to vector<2x8x8xf32>
    %239 = vector.extract_strided_slice %189 {offsets = [0, 88], sizes = [16, 8], strides = [1, 1]} : vector<16x96xf32> to vector<16x8xf32>
    %240 = vector.shape_cast %239 : vector<16x8xf32> to vector<2x8x8xf32>
    "tpu.trace_start"() <{level = 10 : i32, message = "bqd,bkd->bqk"}> : () -> ()
    %cst_81 = arith.constant dense<0.000000e+00> : vector<2x8x8xf32>
    %241 = tpu.matmul %236, %238, %cst_81 {dimension_numbers = #tpu.dot_dimension_numbers<[2], [2], [1], [1], [0, 0, 0, 1, 1, 1], [0], [0]>} : vector<2x8x8xf32>, vector<2x8x8xf32>, vector<2x8x8xf32> -> vector<2x8x8xf32>
    "tpu.trace_stop"() : () -> ()
    %cst_82 = arith.constant 9.09494702E-13 : f32
    %242 = vector.broadcast %cst_82 : f32 to vector<2x8x8xf32>
    %243 = arith.mulf %241, %242 : vector<2x8x8xf32>
    %244 = math.exp %243 : vector<2x8x8xf32>
    %cst_83 = arith.constant dense<0.000000e+00> : vector<2x8xf32>
    %245 = vector.multi_reduction <add>, %244, %cst_83 [2] : vector<2x8x8xf32> to vector<2x8xf32>
    %246 = vector.shape_cast %245 : vector<2x8xf32> to vector<2x8x1xf32>
    %247 = vector.broadcast %246 : vector<2x8x1xf32> to vector<2x8x8xf32>
    %248 = arith.divf %244, %247 : vector<2x8x8xf32>
    "tpu.trace_start"() <{level = 10 : i32, message = "bqk,bkd->bqd"}> : () -> ()
    %cst_84 = arith.constant dense<0.000000e+00> : vector<2x8x8xf32>
    %249 = tpu.matmul %248, %240, %cst_84 {dimension_numbers = #tpu.dot_dimension_numbers<[2], [1], [1], [2], [0, 0, 0, 1, 1, 2], [0], [0]>} : vector<2x8x8xf32>, vector<2x8x8xf32>, vector<2x8x8xf32> -> vector<2x8x8xf32>
    "tpu.trace_stop"() : () -> ()
    %250 = tpu.concatenate %204, %219, %234, %249 in 2 : vector<2x8x8xf32>, vector<2x8x8xf32>, vector<2x8x8xf32>, vector<2x8x8xf32> -> vector<2x8x32xf32>
    %251 = vector.shape_cast %250 : vector<2x8x32xf32> to vector<16x32xf32>
    %cst_85 = arith.constant dense<0.000000e+00> : vector<16x32xf32>
    %252 = tpu.matmul %251, %150, %cst_85 {dimension_numbers = #tpu.dot_dimension_numbers<[1], [0], [0], [1], [0, 0, 1, 1], [], []>} : vector<16x32xf32>, vector<32x32xf32>, vector<16x32xf32> -> vector<16x32xf32>
    %253 = vector.broadcast %158 : vector<1x32xf32> to vector<16x32xf32>
    %254 = arith.addf %252, %253 : vector<16x32xf32>
    %255 = arith.addf %146, %254 : vector<16x32xf32>
    %cst_86 = arith.constant dense<0.000000e+00> : vector<16xf32>
    %256 = vector.multi_reduction <add>, %255, %cst_86 [1] : vector<16x32xf32> to vector<16xf32>
    %257 = vector.shape_cast %256 : vector<16xf32> to vector<16x1xf32>
    %cst_87 = arith.constant 3.200000e+01 : f32
    %258 = vector.broadcast %cst_87 : f32 to vector<16x1xf32>
    %259 = arith.divf %257, %258 : vector<16x1xf32>
    %260 = vector.broadcast %259 : vector<16x1xf32> to vector<16x32xf32>
    %261 = arith.subf %255, %260 : vector<16x32xf32>
    %262 = arith.mulf %261, %261 : vector<16x32xf32>
    %cst_88 = arith.constant dense<0.000000e+00> : vector<16xf32>
    %263 = vector.multi_reduction <add>, %262, %cst_88 [1] : vector<16x32xf32> to vector<16xf32>
    %264 = vector.shape_cast %263 : vector<16xf32> to vector<16x1xf32>
    %cst_89 = arith.constant 3.200000e+01 : f32
    %265 = vector.broadcast %cst_89 : f32 to vector<16x1xf32>
    %266 = arith.divf %264, %265 : vector<16x1xf32>
    %267 = vector.broadcast %259 : vector<16x1xf32> to vector<16x32xf32>
    %268 = arith.subf %255, %267 : vector<16x32xf32>
    %cst_90 = arith.constant 9.99999974E-6 : f32
    %269 = vector.broadcast %cst_90 : f32 to vector<16x1xf32>
    %270 = arith.addf %266, %269 : vector<16x1xf32>
    %271 = math.rsqrt %270 : vector<16x1xf32>
    %272 = vector.broadcast %271 : vector<16x1xf32> to vector<16x32xf32>
    %273 = arith.mulf %268, %272 : vector<16x32xf32>
    %274 = vector.broadcast %163 : vector<1x32xf32> to vector<16x32xf32>
    %275 = arith.mulf %273, %274 : vector<16x32xf32>
    %276 = vector.broadcast %164 : vector<1x32xf32> to vector<16x32xf32>
    %277 = arith.addf %275, %276 : vector<16x32xf32>
    %cst_91 = arith.constant dense<0.000000e+00> : vector<16x64xf32>
    %278 = tpu.matmul %277, %152, %cst_91 {dimension_numbers = #tpu.dot_dimension_numbers<[1], [0], [0], [1], [0, 0, 1, 1], [], []>} : vector<16x32xf32>, vector<32x64xf32>, vector<16x64xf32> -> vector<16x64xf32>
    %279 = vector.broadcast %161 : vector<1x64xf32> to vector<16x64xf32>
    %280 = arith.addf %278, %279 : vector<16x64xf32>
    %cst_92 = arith.constant 0.000000e+00 : f32
    %281 = vector.broadcast %cst_92 : f32 to vector<16x64xf32>
    %282 = arith.maximumf %280, %281 : vector<16x64xf32>
    %cst_93 = arith.constant dense<0.000000e+00> : vector<16x32xf32>
    %283 = tpu.matmul %282, %154, %cst_93 {dimension_numbers = #tpu.dot_dimension_numbers<[1], [0], [0], [1], [0, 0, 1, 1], [], []>} : vector<16x64xf32>, vector<64x32xf32>, vector<16x32xf32> -> vector<16x32xf32>
    %284 = vector.broadcast %162 : vector<1x32xf32> to vector<16x32xf32>
    %285 = arith.addf %283, %284 : vector<16x32xf32>
    %286 = arith.addf %255, %285 : vector<16x32xf32>
    %287 = vector.extract_strided_slice %0 {offsets = [8, 0], sizes = [1, 32], strides = [1, 1]} : vector<9x32xf32> to vector<1x32xf32>
    %288 = vector.broadcast %287 : vector<1x32xf32> to vector<16x32xf32>
    %289 = arith.addf %286, %288 : vector<16x32xf32>
    %290 = vector.shape_cast %289 : vector<16x32xf32> to vector<2x8x32xf32>
    %c0_94 = arith.constant 0 : index
    %c0_95 = arith.constant 0 : index
    %c0_96 = arith.constant 0 : index
    %291 = vector.load %arg8[%c0_94, %c0_95, %c0_96] : memref<2x8x32xf32, #tpu.memory_space<vmem>>, vector<2x8x32xf32>
    tpu.vector_store %arg8[%c0_94, %c0_95, %c0_96], %290 {strides = array<i32>} : memref<2x8x32xf32, #tpu.memory_space<vmem>>, vector<2x8x32xf32>,
    return
  }
  func.func @transform_0(%arg0: i32) -> (i32, i32, i32) {
    %c0_i32 = arith.constant 0 : i32
    %c0_i32_0 = arith.constant 0 : i32
    %c0_i32_1 = arith.constant 0 : i32
    return %arg0, %c0_i32, %c0_i32_0 : i32, i32, i32
  }
  func.func @transform_1(%arg0: i32) -> (i32, i32) {
    %c0_i32 = arith.constant 0 : i32
    %c0_i32_0 = arith.constant 0 : i32
    %c0_i32_1 = arith.constant 0 : i32
    return %c0_i32, %c0_i32_0 : i32, i32
  }
  func.func @transform_2(%arg0: i32) -> (i32, i32, i32) {
    %c0_i32 = arith.constant 0 : i32
    %c0_i32_0 = arith.constant 0 : i32
    %c0_i32_1 = arith.constant 0 : i32
    %c0_i32_2 = arith.constant 0 : i32
    return %c0_i32, %c0_i32_0, %c0_i32_1 : i32, i32, i32
  }
  func.func @transform_3(%arg0: i32) -> (i32, i32, i32) {
    %c0_i32 = arith.constant 0 : i32
    %c0_i32_0 = arith.constant 0 : i32
    %c0_i32_1 = arith.constant 0 : i32
    %c0_i32_2 = arith.constant 0 : i32
    return %c0_i32, %c0_i32_0, %c0_i32_1 : i32, i32, i32
  }
  func.func @transform_4(%arg0: i32) -> (i32, i32, i32) {
    %c0_i32 = arith.constant 0 : i32
    %c0_i32_0 = arith.constant 0 : i32
    %c0_i32_1 = arith.constant 0 : i32
    %c0_i32_2 = arith.constant 0 : i32
    return %c0_i32, %c0_i32_0, %c0_i32_1 : i32, i32, i32
  }
  func.func @transform_5(%arg0: i32) -> (i32, i32, i32) {
    %c0_i32 = arith.constant 0 : i32
    %c0_i32_0 = arith.constant 0 : i32
    %c0_i32_1 = arith.constant 0 : i32
    %c0_i32_2 = arith.constant 0 : i32
    return %c0_i32, %c0_i32_0, %c0_i32_1 : i32, i32, i32
  }
  func.func @transform_6(%arg0: i32) -> (i32, i32, i32) {
    %c0_i32 = arith.constant 0 : i32
    %c0_i32_0 = arith.constant 0 : i32
    %c0_i32_1 = arith.constant 0 : i32
    %c0_i32_2 = arith.constant 0 : i32
    return %c0_i32, %c0_i32_0, %c0_i32_1 : i32, i32, i32
  }
  func.func @transform_7(%arg0: i32) -> (i32, i32, i32) {
    %c0_i32 = arith.constant 0 : i32
    %c0_i32_0 = arith.constant 0 : i32
    %c0_i32_1 = arith.constant 0 : i32
    return %arg0, %c0_i32, %c0_i32_0 : i32, i32, i32
  }
}

</mosaic_0001>

<bundles_post_ra>
// kernel: tpu_custom_call.1
= control target key start
LH: loop header
LB: loop body
LE: loop exit
PB: predicated region body
PF: predicated region fallthrough
CT: control target
= control target key end

     0   :  { %12 = vsyncpa [#allocation3], 0  ;;  %s4950_s0 = inlined_call_operand.hbm [shape: f32[2,8,32], index: 0, kind: input, shape index: {}]   ;;  %s4951_s1 = inlined_call_operand.hbm [shape: f32[9,32], index: 1, kind: input, shape index: {}]   ;;  %s4952_s2 = inlined_call_operand.hbm [shape: f32[2,8,96], index: 2, kind: input, shape index: {}]   ;;  %s4953_s3 = inlined_call_operand.vmem [shape: f32[2,32,96], index: 3, kind: input, shape index: {}]   ;;  %s4954_s4 = inlined_call_operand.vmem [shape: f32[2,32,32], index: 4, kind: input, shape index: {}]   ;;  %s4955_s5 = inlined_call_operand.vmem [shape: f32[2,32,64], index: 5, kind: input, shape index: {}]   ;;  %s4956_s6 = inlined_call_operand.vmem [shape: f32[2,64,32], index: 6, kind: input, shape index: {}]   ;;  %s4957_s7 = inlined_call_operand.hbm [shape: f32[2,8,32], index: 7, kind: output, shape index: {}]  }
   0x1   :  { %13 = vsyncpa [#allocation6], 0 }
   0x2   :  { %14 = vsyncpa [#allocation4], 0  ;;  %s4301_s24 = smov [#allocation5]   ;;  %s4302_s26 = smov [#allocation2]  }
   0x3   :  { %s32_s25 = sshll.u32 %s4301_s24, 4  ;;  %s20_s27 = sshll.u32 %s4302_s26, 4  ;;  %s33_s25 = int_to_ptr.vmem [resolvable:$true] %s32_s25  ;;  %s21_s27 = int_to_ptr.vmem [resolvable:$true] %s20_s27 }
   0x4   :  { %s4223_s28 = scalar_lea.vmem %s33_s25, 256  ;;  %p4228_p1 = scmp.lt.s32.totalorder %s33_s25, %s33_s25 }
   0x5   :  { %p4224_p0 = scmp.ne.s32.totalorder %s33_s25, %s4223_s28  ;;  %p4229_p2 = scmp.lt.s32.totalorder %s4223_s28, %s4223_s28 }
   0x7   :  { %p4230_p3 = por %p4229_p2, %p4228_p1 }
   0x9   :  { %p4231_p4 = pnand %p4230_p3, %p4224_p0 }
   0xb   :  { %4234 = shalt.err (!%p4231_p4)
}
   0xc   :  { %s4303_s29 = smov 128   ;;  %s4304_s30 = smov 8  }
   0xd   :  { %38 = dma.hbm_to_vmem [thread:$0]  %s4951_s1, 256, %s33_s25, [#allocation6], %s4303_s29, %s4303_s29, %s4304_s30  }
   0xe   :  { %s4243_s10 = scalar_lea.vmem %s21_s27, 256  ;;  %p4248_p6 = scmp.lt.s32.totalorder %s21_s27, %s21_s27 }
   0xf   :  { %p4244_p5 = scmp.ne.s32.totalorder %s21_s27, %s4243_s10  ;;  %p4249_p7 = scmp.lt.s32.totalorder %s4243_s10, %s4243_s10 }
  0x11   :  { %p4250_p8 = por %p4249_p7, %p4248_p6 }
  0x13   :  { %p4251_p9 = pnand %p4250_p8, %p4244_p5 }
  0x15   :  { %4254 = shalt.err (!%p4251_p9)
}
  0x16   :  { %26 = dma.hbm_to_vmem [thread:$0]  %s4950_s0, 256, %s21_s27, [#allocation3], %s4303_s29, %s4303_s29, %s4304_s30  }
  0x17   :  { %s4305_s13 = smov [#allocation7]  }
  0x18   :  { %s44_s14 = sshll.u32 %s4305_s13, 4  ;;  %s45_s14 = int_to_ptr.vmem [resolvable:$true] %s44_s14 }
  0x19   :  { %s4263_s15 = scalar_lea.vmem %s45_s14, 256  ;;  %p4268_p11 = scmp.lt.s32.totalorder %s45_s14, %s45_s14 }
  0x1a   :  { %p4264_p10 = scmp.ne.s32.totalorder %s45_s14, %s4263_s15  ;;  %p4269_p12 = scmp.lt.s32.totalorder %s4263_s15, %s4263_s15 }
  0x1c   :  { %p4270_p13 = por %p4269_p12, %p4268_p11 }
  0x1e   :  { %p4271_p0 = pnand %p4270_p13, %p4264_p10 }
  0x20   :  { %4274 = shalt.err (!%p4271_p0)
}
  0x21   :  { %50 = dma.hbm_to_vmem [thread:$0]  %s4952_s2, 256, %s45_s14, [#allocation6], %s4303_s29, %s4303_s29, %s4304_s30  }
  0x22   :  { %4295 = dma.done.wait [#allocation3], 256  }
  0x23   :  { %4296 = vsyncadd [#allocation3], 4294967040 }
  0x24   :  { %4297 = dma.done.wait [#allocation6], 512  }
  0x25   :  { %4298 = vsyncadd [#allocation6], 4294966784  ;;  %v68_v0 = vld [vmem:[#allocation5] sm:$0xff]  ;;  %v70_v1 = vld [vmem:[#allocation2] sm:$0xff]  ;;  %vm95_vm0 = vcmask 261120   ;;  %v123_v26 = vlaneseq  ;;  %v4306_v42 = vmov 0.0  }
  0x26   :  { %v71_v2 = vld [vmem:[#allocation2 + $0x8] sm:$0xff]  ;;  %v4380_v3 = vadd.f32 %v70_v1, %v68_v0  ;;  %v77_v17 = vld [vmem:[%s4953_s3 + $0x18] sm:$0xff]  ;;  %v76_v18 = vld [vmem:[%s4953_s3 + $0x10] sm:$0xff]  ;;  %3871 = vmatprep.subr.mxu0 %v4306_v42  ;;  %vm4307_vm1 = vmmov 0   ;;  %s4308_s23 = smov 96   ;;  %s4309_s24 = smov 64  }
  0x27   :  { %v4382_v4 = vadd.f32 %v71_v2, %v68_v0  ;;  %3850 = vmatprep.subr.mxu1 %v77_v17  ;;  %v75_v19 = vld [vmem:[%s4953_s3 + $0x8] sm:$0xff]  ;;  %v74_v20 = vld [vmem:[%s4953_s3] sm:$0xff]  ;;  %v4404_v28 = vshrl.u32 %v123_v26, 7  ;;  %3873 = vmatprep.mubr.msk.f32.mxu0 %vm4307_vm1, %v4306_v42  ;;  %s4310_s25 = smov 88   ;;  %vm223_vm2 = vcmask 64512   ;;  %s4311_s26 = smov 120  }
  0x28   :  { %v96_v5 = vsel %vm95_vm0, %v4380_v3, 0.0  ;;  %3851 = vmatpush3.msra.mxu1 %v77_v17  ;;  %v4407_v30 = vld [vmem:[#allocation7] sm:$0xff]  ;;  %s4312_s27 = smov 56   ;;  %s4313_s28 = smov 80   ;;  %vm1541_vm3 = vcmask 130048   ;;  %vm1544_vm4 = vcmask 195584  }
  0x29   :  { %97 = vadd.xlane.f32.xlu0 %v96_v5  ;;  %v99_v6 = vsel %vm95_vm0, %v4382_v4, 0.0  ;;  %3852 = vmatprep.subr.mxu1 %v76_v18  ;;  %v125_v29 = vsub.s32 2, %v4404_v28  ;;  %v131_v31 = vsub.s32 3, %v4404_v28  ;;  %v137_v43 = vsub.s32 0, %v4404_v28  ;;  %s4314_s8 = smov 112   ;;  %s4315_s9 = smov 48  }
  0x2a   :  { %3853 = vmatpush3.msra.mxu1 %v76_v18  ;;  %s4316_s10 = smov 72   ;;  %s4317_s11 = smov 104   ;;  %vm1763_vm5 = vcmask 523264  }
  0x2b   :  { %3854 = vmatprep.subr.mxu1 %v75_v19  ;;  %v126_v32 = vrot.slane %v4407_v30, %v125_v29  ;;  %v132_v35 = vrot.slane %v4407_v30, %v131_v31  ;;  %v138_v44 = vrot.slane %v4407_v30, %v137_v43  ;;  %s4318_s12 = smov 40   ;;  %s4319_s13 = smov 16  }
  0x2c   :  { %3855 = vmatpush3.msra.mxu1 %v75_v19  ;;  %s4320_s19 = smov 24  }
  0x2d   :  { %100 = vadd.xlane.f32.xlu0 %v99_v6  ;;  %3856 = vmatprep.subr.mxu1 %v74_v20 }
  0x2e   :  { %3857 = vmatpush3.msra.mxu1 %v74_v20 }
  0x2f   :  { %3861 = vmatprep.subr.mxu1 %v4306_v42 }
  0xb2   :  { %v98_v7 = vpop.xlane.xlu0 %97 }
  0xb3   :  { %v103_v8 = vmul.f32 0.03125, %v98_v7 }
  0xb5   :  { %v105_v9 = vsub.f32 %v4380_v3, %v103_v8 }
  0xb6   :  { %v101_v10 = vpop.xlane.xlu0 %100 }
  0xb7   :  { %v104_v11 = vmul.f32 0.03125, %v101_v10  ;;  %v107_v12 = vmul.f32 %v105_v9, %v105_v9 }
  0xb9   :  { %v106_v13 = vsub.f32 %v4382_v4, %v104_v11  ;;  %v109_v14 = vsel %vm95_vm0, %v107_v12, 0.0 }
  0xba   :  { %110 = vadd.xlane.f32.xlu1 %v109_v14 }
  0xbb   :  { %v108_v15 = vmul.f32 %v106_v13, %v106_v13 }
  0xbd   :  { %v112_v16 = vsel %vm95_vm0, %v108_v15, 0.0 }
  0xbe   :  { %113 = vadd.xlane.f32.xlu1 %v112_v16 }
 0x143   :  { %v111_v21 = vpop.xlane.xlu1 %110 }
 0x144   :  { %v115_v22 = vmul.f32 0.03125, %v111_v21 }
 0x146   :  { %v117_v23 = vadd.f32 1e-05, %v115_v22 }
 0x147   :  { %v114_v24 = vpop.xlane.xlu1 %113 }
 0x148   :  { %4135 = vrsqrt.f32 %v117_v23  ;;  %v116_v25 = vmul.f32 0.03125, %v114_v24 }
 0x14a   :  { %v118_v27 = vadd.f32 1e-05, %v116_v25 }
 0x14c   :  { %4137 = vrsqrt.f32 %v118_v27 }
 0x155   :  { %v4136_v33 = vpop.eup %4135 }
 0x156   :  { %v121_v34 = vmul.f32 %v4136_v33, %v105_v9 }
 0x158   :  { %v127_v36 = vmul.f32 %v126_v32, %v121_v34 }
 0x159   :  { %v4138_v37 = vpop.eup %4137 }
 0x15a   :  { %v122_v38 = vmul.f32 %v4138_v37, %v106_v13  ;;  %v133_v39 = vadd.f32 %v132_v35, %v127_v36 }
 0x15c   :  { %v128_v40 = vmul.f32 %v126_v32, %v122_v38  ;;  %3858 = vmatprep.mubr.msk.f32.mxu1 %vm95_vm0, %v133_v39 }
 0x15e   :  { %v134_v41 = vadd.f32 %v132_v35, %v128_v40 }
 0x160   :  { %3859 = vmatmul.mubr.msk.f32.vlgmr.msra.gmra.mxu1 %vm95_vm0, %v134_v41 }
 0x161   :  { %3863 = vmatprep.mubr.msk.f32.mxu1 %vm4307_vm1, %v4306_v42 }
 0x220   :  { %v3860_v45 = vpop.f32.mrf.mxu1 }
 0x221   :  { %v4428_v46 = vadd.f32 %v3860_v45, %v138_v44 }
 0x222   :  { %v211_v47 = vpop.f32.mrf.mxu1 }
 0x223   :  { %v4430_v48 = vadd.f32 %v211_v47, %v138_v44  ;;  %299 = vrot.lane.b32.xlu1 %v4428_v46, %s4308_s23 }
 0x225   :  { %221 = vrot.lane.b32.xlu0 %v4430_v48, %s4308_s23 }
 0x227   :  { %467 = vrot.lane.b32.xlu1 %v4428_v46, %s4309_s24 }
 0x229   :  { %391 = vrot.lane.b32.xlu0 %v4430_v48, %s4309_s24 }
 0x22b   :  { %623 = vrot.lane.b32.xlu1 %v4428_v46, %s4310_s25 }
 0x22f   :  { %545 = vrot.lane.b32.xlu1 %v4430_v48, %s4310_s25 }
 0x295   :  { %v300_v50 = vpop.permute.xlu1 %299 }
 0x297   :  { %v222_v49 = vpop.permute.xlu0 %221 }
 0x298   :  { %3862 = vmatpush3.xpose.msk.msra.mxu1 %vm223_vm2, %v222_v49 }
 0x299   :  { %3866 = vmatprep.subr.mxu1 %v4306_v42  ;;  %v468_v52 = vpop.permute.xlu1 %467 }
 0x29b   :  { %3864 = vmatmul.mubr.msk.f32.vlgmr.msra.gmra.mxu1 %vm223_vm2, %v4430_v48  ;;  %v392_v51 = vpop.permute.xlu0 %391 }
 0x29c   :  { %3867 = vmatpush3.xpose.msk.msra.mxu1 %vm223_vm2, %v300_v50  ;;  %3872 = vmatpush3.msra.mxu0 %v392_v51 }
 0x29d   :  { %3868 = vmatprep.mubr.msk.f32.mxu1 %vm4307_vm1, %v4306_v42  ;;  %3876 = vmatprep.subr.mxu1 %v4306_v42  ;;  %v624_v1 = vpop.permute.xlu1 %623 }
 0x29e   :  { %3881 = vmatprep.subr.mxu0 %v4306_v42 }
 0x29f   :  { %3869 = vmatmul.mubr.msk.f32.vlgmr.msra.gmra.mxu1 %vm223_vm2, %v4428_v46 }
 0x2a0   :  { %3877 = vmatpush3.msra.mxu1 %v468_v52  ;;  %3878 = vmatprep.mubr.msk.f32.mxu1 %vm4307_vm1, %v4306_v42 }
 0x2a1   :  { %3886 = vmatprep.subr.mxu1 %v4306_v42  ;;  %v546_v2 = vpop.permute.xlu1 %545 }
 0x35b   :  { %v294_v53 = vpop.f32.mrf.mxu1 }
 0x35c   :  { %v375_v54 = vmul.f32 9.094947e-13, %v294_v53 }
 0x35d   :  { %v3865_v55 = vpop.f32.mrf.mxu1 }
 0x35e   :  { %v377_v56 = vmul.f32 1.442695, %v375_v54 }
 0x35f   :  { %v371_v57 = vpop.f32.mrf.mxu1 }
 0x360   :  { %4139 = vpow2.f32 %v377_v56  ;;  %v376_v58 = vmul.f32 9.094947e-13, %v371_v57 }
 0x361   :  { %v3870_v59 = vpop.f32.mrf.mxu1 }
 0x362   :  { %v379_v60 = vmul.f32 1.442695, %v376_v58 }
 0x364   :  { %4141 = vpow2.f32 %v379_v60 }
 0x36d   :  { %v4140_v61 = vpop.eup %4139 }
 0x36e   :  { %v381_v62 = vsel %vm223_vm2, %v4140_v61, 0.0 }
 0x36f   :  { %382 = vadd.xlane.f32.xlu1 %v381_v62 }
 0x371   :  { %v4142_v63 = vpop.eup %4141 }
 0x372   :  { %v384_v0 = vsel %vm223_vm2, %v4142_v63, 0.0 }
 0x373   :  { %385 = vadd.xlane.f32.xlu0 %v384_v0 }
 0x380   :  { %621 = vrot.lane.b32.xlu1 %v4428_v46, %s4311_s26 }
 0x384   :  { %791 = vrot.lane.b32.xlu1 %v4428_v46, %s4312_s27 }
 0x388   :  { %947 = vrot.lane.b32.xlu1 %v4428_v46, %s4313_s28 }
 0x389   :  { %543 = vrot.lane.b32.xlu0 %v4430_v48, %s4311_s26 }
 0x38d   :  { %715 = vrot.lane.b32.xlu0 %v4430_v48, %s4312_s27 }
 0x3f8   :  { %v383_v5 = vpop.xlane.xlu1 %382 }
 0x3f9   :  { %4143 = vrcp.f32 %v383_v5 }
 0x3fc   :  { %v386_v6 = vpop.xlane.xlu0 %385  ;;  %v622_v11 = vpop.permute.xlu1 %621 }
 0x3fd   :  { %4145 = vrcp.f32 %v386_v6 }
 0x400   :  { %v544_v8 = vpop.permute.xlu0 %543  ;;  %v792_v14 = vpop.permute.xlu1 %791 }
 0x404   :  { %v716_v13 = vpop.permute.xlu0 %715  ;;  %v948_v35 = vpop.permute.xlu1 %947 }
 0x406   :  { %v4144_v7 = vpop.eup %4143 }
 0x407   :  { %v388_v9 = vmul.f32 %v4144_v7, %v4140_v61 }
 0x409   :  { %3874 = vmatmul.mubr.msk.f32.vlgmr.msra.gmra.mxu0 %vm223_vm2, %v388_v9 }
 0x40a   :  { %v4146_v10 = vpop.eup %4145  ;;  %3882 = vmatpush3.xpose.msk.msra.mxu0 %vm223_vm2, %v546_v2  ;;  %3883 = vmatprep.mubr.msk.f32.mxu0 %vm4307_vm1, %v4306_v42 }
 0x40b   :  { %3891 = vmatprep.subr.mxu0 %v4306_v42  ;;  %v390_v12 = vmul.f32 %v4146_v10, %v4142_v63 }
 0x40d   :  { %3879 = vmatmul.mubr.msk.f32.vlgmr.msra.gmra.mxu1 %vm223_vm2, %v390_v12  ;;  %3884 = vmatmul.mubr.msk.f32.vlgmr.msra.gmra.mxu0 %vm223_vm2, %v544_v8 }
 0x40e   :  { %3887 = vmatpush3.xpose.msk.msra.mxu1 %vm223_vm2, %v624_v1  ;;  %3892 = vmatpush3.msra.mxu0 %v716_v13 }
 0x40f   :  { %3888 = vmatprep.mubr.msk.f32.mxu1 %vm4307_vm1, %v4306_v42  ;;  %3896 = vmatprep.subr.mxu1 %v4306_v42 }
 0x410   :  { %3893 = vmatprep.mubr.msk.f32.mxu0 %vm4307_vm1, %v4306_v42  ;;  %3901 = vmatprep.subr.mxu0 %v4306_v42 }
 0x411   :  { %3889 = vmatmul.mubr.msk.f32.vlgmr.msra.gmra.mxu1 %vm223_vm2, %v622_v11 }
 0x412   :  { %3897 = vmatpush3.msra.mxu1 %v792_v14  ;;  %3898 = vmatprep.mubr.msk.f32.mxu1 %vm4307_vm1, %v4306_v42 }
 0x413   :  { %3906 = vmatprep.subr.mxu1 %v4306_v42 }
 0x4c9   :  { %v4488_v15 = vpop.f32.mrf.mxu0 }
 0x4cb   :  { %v3875_v16 = vpop.f32.mrf.mxu0 }
 0x4cd   :  { %v4490_v17 = vpop.f32.mrf.mxu1  ;;  %v617_v18 = vpop.f32.mrf.mxu0 }
 0x4ce   :  { %v699_v19 = vmul.f32 9.094947e-13, %v617_v18 }
 0x4cf   :  { %v3880_v20 = vpop.f32.mrf.mxu1  ;;  %v3885_v21 = vpop.f32.mrf.mxu0 }
 0x4d0   :  { %v701_v22 = vmul.f32 1.442695, %v699_v19 }
 0x4d1   :  { %v695_v23 = vpop.f32.mrf.mxu1 }
 0x4d2   :  { %4147 = vpow2.f32 %v701_v22  ;;  %v700_v24 = vmul.f32 9.094947e-13, %v695_v23 }
 0x4d3   :  { %v3890_v25 = vpop.f32.mrf.mxu1 }
 0x4d4   :  { %v703_v26 = vmul.f32 1.442695, %v700_v24 }
 0x4d6   :  { %4149 = vpow2.f32 %v703_v26 }
 0x4df   :  { %v4148_v27 = vpop.eup %4147 }
 0x4e0   :  { %v705_v32 = vsel %vm223_vm2, %v4148_v27, 0.0 }
 0x4e1   :  { %706 = vadd.xlane.f32.xlu0 %v705_v32 }
 0x4e3   :  { %v4150_v33 = vpop.eup %4149 }
 0x4e4   :  { %v708_v34 = vsel %vm223_vm2, %v4150_v33, 0.0 }
 0x4e5   :  { %709 = vadd.xlane.f32.xlu1 %v708_v34 }
 0x4f6   :  { %945 = vrot.lane.b32.xlu1 %v4428_v46, %s4314_s8 }
 0x4f7   :  { %869 = vrot.lane.b32.xlu0 %v4430_v48, %s4313_s28 }
 0x4fa   :  { %1115 = vrot.lane.b32.xlu1 %v4428_v46, %s4315_s9 }
 0x4fb   :  { %867 = vrot.lane.b32.xlu0 %v4430_v48, %s4314_s8 }
 0x4fe   :  { %1271 = vrot.lane.b32.xlu1 %v4428_v46, %s4316_s10 }
 0x4ff   :  { %1039 = vrot.lane.b32.xlu0 %v4430_v48, %s4315_s9 }
 0x56a   :  { %v707_v36 = vpop.xlane.xlu0 %706 }
 0x56b   :  { %4151 = vrcp.f32 %v707_v36 }
 0x56e   :  { %v710_v37 = vpop.xlane.xlu1 %709  ;;  %v870_v38 = vpop.permute.xlu0 %869 }
 0x56f   :  { %4153 = vrcp.f32 %v710_v37 }
 0x572   :  { %v868_v40 = vpop.permute.xlu0 %867  ;;  %v946_v45 = vpop.permute.xlu1 %945 }
 0x576   :  { %v1040_v49 = vpop.permute.xlu0 %1039  ;;  %v1116_v50 = vpop.permute.xlu1 %1115 }
 0x578   :  { %v4152_v39 = vpop.eup %4151 }
 0x579   :  { %v712_v41 = vmul.f32 %v4152_v39, %v4148_v27 }
 0x57a   :  { %v1272_v5 = vpop.permute.xlu1 %1271 }
 0x57b   :  { %3894 = vmatmul.mubr.msk.f32.vlgmr.msra.gmra.mxu0 %vm223_vm2, %v712_v41 }
 0x57c   :  { %v4154_v44 = vpop.eup %4153  ;;  %3902 = vmatpush3.xpose.msk.msra.mxu0 %vm223_vm2, %v870_v38  ;;  %3903 = vmatprep.mubr.msk.f32.mxu0 %vm4307_vm1, %v4306_v42 }
 0x57d   :  { %3911 = vmatprep.subr.mxu0 %v4306_v42  ;;  %v714_v47 = vmul.f32 %v4154_v44, %v4150_v33 }
 0x57f   :  { %3899 = vmatmul.mubr.msk.f32.vlgmr.msra.gmra.mxu1 %vm223_vm2, %v714_v47  ;;  %3904 = vmatmul.mubr.msk.f32.vlgmr.msra.gmra.mxu0 %vm223_vm2, %v868_v40  ;;  %v80_v47 = vld [vmem:[%s4954_s4 + $0x10] sm:$0xff] }
 0x580   :  { %3907 = vmatpush3.xpose.msk.msra.mxu1 %vm223_vm2, %v948_v35  ;;  %3912 = vmatpush3.msra.mxu0 %v1040_v49  ;;  %v79_v49 = vld [vmem:[%s4954_s4 + $0x8] sm:$0xff] }
 0x581   :  { %3908 = vmatprep.mubr.msk.f32.mxu1 %vm4307_vm1, %v4306_v42  ;;  %3916 = vmatprep.subr.mxu1 %v4306_v42 }
 0x582   :  { %3913 = vmatprep.mubr.msk.f32.mxu0 %vm4307_vm1, %v4306_v42  ;;  %3921 = vmatprep.subr.mxu0 %v4306_v42 }
 0x583   :  { %3909 = vmatmul.mubr.msk.f32.vlgmr.msra.gmra.mxu1 %vm223_vm2, %v946_v45  ;;  %v81_v45 = vld [vmem:[%s4954_s4 + $0x18] sm:$0xff] }
 0x584   :  { %3917 = vmatpush3.msra.mxu1 %v1116_v50  ;;  %3918 = vmatprep.mubr.msk.f32.mxu1 %vm4307_vm1, %v4306_v42  ;;  %v78_v50 = vld [vmem:[%s4954_s4] sm:$0xff] }
 0x585   :  { %3926 = vmatprep.subr.mxu1 %v4306_v42 }
 0x63b   :  { %v4524_v51 = vpop.f32.mrf.mxu0 }
 0x63d   :  { %v3895_v52 = vpop.f32.mrf.mxu0 }
 0x63f   :  { %v4526_v53 = vpop.f32.mrf.mxu1  ;;  %v941_v54 = vpop.f32.mrf.mxu0 }
 0x640   :  { %v1023_v55 = vmul.f32 9.094947e-13, %v941_v54 }
 0x641   :  { %v3900_v56 = vpop.f32.mrf.mxu1  ;;  %v3905_v57 = vpop.f32.mrf.mxu0 }
 0x642   :  { %v1025_v58 = vmul.f32 1.442695, %v1023_v55 }
 0x643   :  { %v1019_v59 = vpop.f32.mrf.mxu1 }
 0x644   :  { %4155 = vpow2.f32 %v1025_v58  ;;  %v1024_v60 = vmul.f32 9.094947e-13, %v1019_v59 }
 0x645   :  { %v3910_v61 = vpop.f32.mrf.mxu1 }
 0x646   :  { %v1027_v62 = vmul.f32 1.442695, %v1024_v60 }
 0x648   :  { %4157 = vpow2.f32 %v1027_v62 }
 0x651   :  { %v4156_v63 = vpop.eup %4155 }
 0x652   :  { %v1029_v0 = vsel %vm223_vm2, %v4156_v63, 0.0 }
 0x653   :  { %1030 = vadd.xlane.f32.xlu0 %v1029_v0 }
 0x655   :  { %v4158_v1 = vpop.eup %4157 }
 0x656   :  { %v1032_v2 = vsel %vm223_vm2, %v4158_v1, 0.0 }
 0x657   :  { %1033 = vadd.xlane.f32.xlu1 %v1032_v2 }
 0x668   :  { %1269 = vrot.lane.b32.xlu1 %v4428_v46, %s4317_s11 }
 0x669   :  { %1193 = vrot.lane.b32.xlu0 %v4430_v48, %s4316_s10 }
 0x66d   :  { %1191 = vrot.lane.b32.xlu0 %v4430_v48, %s4317_s11 }
 0x6dc   :  { %v1031_v6 = vpop.xlane.xlu0 %1030 }
 0x6dd   :  { %4159 = vrcp.f32 %v1031_v6 }
 0x6e0   :  { %v1034_v7 = vpop.xlane.xlu1 %1033  ;;  %v1194_v9 = vpop.permute.xlu0 %1193 }
 0x6e1   :  { %4161 = vrcp.f32 %v1034_v7 }
 0x6e4   :  { %v1192_v13 = vpop.permute.xlu0 %1191  ;;  %v1270_v14 = vpop.permute.xlu1 %1269 }
 0x6ea   :  { %v4160_v8 = vpop.eup %4159 }
 0x6eb   :  { %v1036_v10 = vmul.f32 %v4160_v8, %v4156_v63 }
 0x6ed   :  { %3914 = vmatmul.mubr.msk.f32.vlgmr.msra.gmra.mxu0 %vm223_vm2, %v1036_v10 }
 0x6ee   :  { %v4162_v11 = vpop.eup %4161  ;;  %3922 = vmatpush3.xpose.msk.msra.mxu0 %vm223_vm2, %v1194_v9  ;;  %3923 = vmatprep.mubr.msk.f32.mxu0 %vm4307_vm1, %v4306_v42 }
 0x6ef   :  { %v1038_v12 = vmul.f32 %v4162_v11, %v4158_v1  ;;  %3931 = vmatprep.subr.mxu0 %v4306_v42 }
 0x6f1   :  { %3919 = vmatmul.mubr.msk.f32.vlgmr.msra.gmra.mxu1 %vm223_vm2, %v1038_v12  ;;  %3924 = vmatmul.mubr.msk.f32.vlgmr.msra.gmra.mxu0 %vm223_vm2, %v1192_v13 }
 0x6f2   :  { %3927 = vmatpush3.xpose.msk.msra.mxu1 %vm223_vm2, %v1272_v5  ;;  %3928 = vmatprep.mubr.msk.f32.mxu1 %vm4307_vm1, %v4306_v42 }
 0x6f3   :  { %3936 = vmatprep.subr.mxu1 %v4306_v42  ;;  %3933 = vmatprep.mubr.msk.f32.mxu0 %vm4307_vm1, %v4306_v42 }
 0x6f5   :  { %3929 = vmatmul.mubr.msk.f32.vlgmr.msra.gmra.mxu1 %vm223_vm2, %v1270_v14 }
 0x6f6   :  { %3938 = vmatprep.mubr.msk.f32.mxu1 %vm4307_vm1, %v4306_v42 }
 0x7ad   :  { %v1111_v16 = vpop.f32.mrf.mxu0 }
 0x7af   :  { %v3915_v18 = vpop.f32.mrf.mxu0 }
 0x7b1   :  { %v1187_v19 = vpop.f32.mrf.mxu1  ;;  %v1265_v20 = vpop.f32.mrf.mxu0 }
 0x7b2   :  { %v1347_v21 = vmul.f32 9.094947e-13, %v1265_v20 }
 0x7b3   :  { %v3920_v22 = vpop.f32.mrf.mxu1  ;;  %v3925_v23 = vpop.f32.mrf.mxu0 }
 0x7b4   :  { %v1349_v24 = vmul.f32 1.442695, %v1347_v21  ;;  %v85_v23 = vld [vmem:[%s4955_s5 + $0x18] sm:$0xff] }
 0x7b5   :  { %v1343_v25 = vpop.f32.mrf.mxu1 }
 0x7b6   :  { %4163 = vpow2.f32 %v1349_v24  ;;  %v1348_v26 = vmul.f32 9.094947e-13, %v1343_v25  ;;  %v84_v24 = vld [vmem:[%s4955_s5 + $0x10] sm:$0xff]  ;;  %v83_v25 = vld [vmem:[%s4955_s5 + $0x8] sm:$0xff] }
 0x7b7   :  { %v3930_v27 = vpop.f32.mrf.mxu1 }
 0x7b8   :  { %v1351_v32 = vmul.f32 1.442695, %v1348_v26  ;;  %v82_v26 = vld [vmem:[%s4955_s5] sm:$0xff]  ;;  %v93_v27 = vld [vmem:[%s4956_s6 + $0x38] sm:$0xff] }
 0x7ba   :  { %4165 = vpow2.f32 %v1351_v32  ;;  %v92_v32 = vld [vmem:[%s4956_s6 + $0x30] sm:$0xff] }
 0x7c3   :  { %v4164_v33 = vpop.eup %4163 }
 0x7c4   :  { %v1353_v34 = vsel %vm223_vm2, %v4164_v33, 0.0 }
 0x7c5   :  { %1354 = vadd.xlane.f32.xlu0 %v1353_v34  ;;  %v90_v34 = vld [vmem:[%s4956_s6 + $0x20] sm:$0xff] }
 0x7c7   :  { %v4166_v35 = vpop.eup %4165 }
 0x7c8   :  { %v1356_v36 = vsel %vm223_vm2, %v4166_v35, 0.0 }
 0x7c9   :  { %1357 = vadd.xlane.f32.xlu1 %v1356_v36 }
 0x7da   :  { %1439 = vrot.lane.b32.xlu1 %v4428_v46, %s4318_s12 }
 0x7db   :  { %1363 = vrot.lane.b32.xlu0 %v4430_v48, %s4318_s12 }
 0x7de   :  { %1519 = vrot.lane.b32.xlu1 %v4526_v53, %s4304_s30 }
 0x7df   :  { %1517 = vrot.lane.b32.xlu0 %v4524_v51, %s4304_s30 }
 0x7e2   :  { %1527 = vrot.lane.b32.xlu1 %v1187_v19, %s4319_s13 }
 0x7e3   :  { %1525 = vrot.lane.b32.xlu0 %v1111_v16, %s4319_s13 }
 0x84e   :  { %v1355_v37 = vpop.xlane.xlu0 %1354 }
 0x84f   :  { %4167 = vrcp.f32 %v1355_v37 }
 0x852   :  { %v1358_v38 = vpop.xlane.xlu1 %1357  ;;  %v1364_v39 = vpop.permute.xlu0 %1363 }
 0x853   :  { %4169 = vrcp.f32 %v1358_v38  ;;  %3932 = vmatpush3.msra.mxu0 %v1364_v39 }
 0x854   :  { %3941 = vmatprep.subr.mxu0 %v81_v45 }
 0x856   :  { %v1440_v46 = vpop.permute.xlu1 %1439  ;;  %v1518_v55 = vpop.permute.xlu0 %1517 }
 0x857   :  { %3937 = vmatpush3.msra.mxu1 %v1440_v46  ;;  %v1539_v58 = vsel %vm223_vm2, %v4488_v15, %v1518_v55  ;;  %v1549_v15 = vsub.s32 1, %v4404_v28  ;;  %v89_v55 = vld [vmem:[%s4956_s6 + $0x18] sm:$0xff] }
 0x858   :  { %3952 = vmatprep.subr.mxu1 %v85_v23 }
 0x859   :  { %v1550_v5 = vrot.slane %v4407_v30, %v1549_v15 }
 0x85a   :  { %v1520_v56 = vpop.permute.xlu1 %1519  ;;  %v1526_v57 = vpop.permute.xlu0 %1525 }
 0x85b   :  { %v1542_v59 = vsel %vm1541_vm3, %v1539_v58, %v1526_v57  ;;  %v1540_v63 = vsel %vm223_vm2, %v4490_v17, %v1520_v56  ;;  %v88_v56 = vld [vmem:[%s4956_s6 + $0x10] sm:$0xff]  ;;  %v87_v57 = vld [vmem:[%s4956_s6 + $0x8] sm:$0xff]  ;;  %v86_v58 = vld [vmem:[%s4956_s6] sm:$0xff] }
 0x85c   :  { %v4168_v48 = vpop.eup %4167 }
 0x85d   :  { %v1360_v40 = vmul.f32 %v4168_v48, %v4164_v33  ;;  %v91_v33 = vld [vmem:[%s4956_s6 + $0x28] sm:$0xff]  ;;  %v1662_v48 = vsub.s32 6, %v4404_v28 }
 0x85e   :  { %v1528_v60 = vpop.permute.xlu1 %1527 }
 0x85f   :  { %3934 = vmatmul.mubr.msk.f32.vlgmr.msra.gmra.mxu0 %vm223_vm2, %v1360_v40  ;;  %v1543_v0 = vsel %vm1541_vm3, %v1540_v63, %v1528_v60  ;;  %v1668_v40 = vsub.s32 7, %v4404_v28 }
 0x860   :  { %v4170_v41 = vpop.eup %4169  ;;  %3942 = vmatpush3.msra.mxu0 %v81_v45 }
 0x861   :  { %v1362_v44 = vmul.f32 %v4170_v41, %v4166_v35  ;;  %3943 = vmatprep.subr.mxu0 %v80_v47  ;;  %v1663_v41 = vrot.slane %v4407_v30, %v1662_v48 }
 0x862   :  { %3944 = vmatpush3.msra.mxu0 %v80_v47  ;;  %v1669_v47 = vrot.slane %v4407_v30, %v1668_v40 }
 0x863   :  { %3939 = vmatmul.mubr.msk.f32.vlgmr.msra.gmra.mxu1 %vm223_vm2, %v1362_v44  ;;  %3945 = vmatprep.subr.mxu0 %v79_v49 }
 0x864   :  { %3946 = vmatpush3.msra.mxu0 %v79_v49  ;;  %3953 = vmatpush3.msra.mxu1 %v85_v23  ;;  %v3680_v23 = vld [vmem:[%s4953_s3 + $0x38] sm:$0xff] }
 0x865   :  { %3947 = vmatprep.subr.mxu0 %v78_v50  ;;  %3954 = vmatprep.subr.mxu1 %v84_v24 }
 0x866   :  { %3948 = vmatpush3.msra.mxu0 %v78_v50  ;;  %3955 = vmatpush3.msra.mxu1 %v84_v24  ;;  %v3679_v24 = vld [vmem:[%s4953_s3 + $0x30] sm:$0xff] }
 0x867   :  { %3956 = vmatprep.subr.mxu1 %v83_v25  ;;  %3963 = vmatprep.subr.mxu0 %v93_v27 }
 0x868   :  { %3957 = vmatpush3.msra.mxu1 %v83_v25  ;;  %v3678_v25 = vld [vmem:[%s4953_s3 + $0x28] sm:$0xff] }
 0x869   :  { %3958 = vmatprep.subr.mxu1 %v82_v26 }
 0x86a   :  { %3959 = vmatpush3.msra.mxu1 %v82_v26  ;;  %v3677_v26 = vld [vmem:[%s4953_s3 + $0x20] sm:$0xff] }
 0x86b   :  { %3982 = vmatprep.subr.mxu1 %v3680_v23 }
 0x91f   :  { %v1435_v51 = vpop.f32.mrf.mxu0 }
 0x920   :  { %1533 = vrot.lane.b32.xlu0 %v1435_v51, %s4320_s19 }
 0x921   :  { %v3935_v52 = vpop.f32.mrf.mxu0 }
 0x923   :  { %v1511_v53 = vpop.f32.mrf.mxu1 }
 0x924   :  { %1535 = vrot.lane.b32.xlu1 %v1511_v53, %s4320_s19 }
 0x925   :  { %v3940_v54 = vpop.f32.mrf.mxu1 }
 0x992   :  { %v1534_v61 = vpop.permute.xlu0 %1533 }
 0x993   :  { %v1545_v62 = vsel %vm1544_vm4, %v1542_v59, %v1534_v61  ;;  %v1674_v59 = vsub.s32 4, %v4404_v28 }
 0x994   :  { %3949 = vmatprep.mubr.msk.f32.mxu0 %vm95_vm0, %v1545_v62 }
 0x995   :  { %v1675_v60 = vrot.slane %v4407_v30, %v1674_v59 }
 0x996   :  { %v1536_v1 = vpop.permute.xlu1 %1535 }
 0x997   :  { %v1546_v2 = vsel %vm1544_vm4, %v1543_v0, %v1536_v1 }
 0x998   :  { %3950 = vmatmul.mubr.msk.f32.vlgmr.msra.gmra.mxu0 %vm95_vm0, %v1546_v2 }
 0x999   :  { %3964 = vmatpush3.msra.mxu0 %v93_v27 }
 0x99a   :  { %3965 = vmatprep.subr.mxu0 %v92_v32 }
 0x99b   :  { %3966 = vmatpush3.msra.mxu0 %v92_v32 }
 0x99c   :  { %3967 = vmatprep.subr.mxu0 %v91_v33 }
 0x99d   :  { %3968 = vmatpush3.msra.mxu0 %v91_v33 }
 0x99e   :  { %3969 = vmatprep.subr.mxu0 %v90_v34 }
 0x99f   :  { %3970 = vmatpush3.msra.mxu0 %v90_v34 }
 0x9a0   :  { %3971 = vmatprep.subr.mxu0 %v89_v55 }
 0x9a1   :  { %3972 = vmatpush3.msra.mxu0 %v89_v55 }
 0x9a2   :  { %3973 = vmatprep.subr.mxu0 %v88_v56 }
 0x9a3   :  { %3974 = vmatpush3.msra.mxu0 %v88_v56 }
 0x9a4   :  { %3975 = vmatprep.subr.mxu0 %v87_v57 }
 0x9a5   :  { %3976 = vmatpush3.msra.mxu0 %v87_v57 }
 0x9a6   :  { %3977 = vmatprep.subr.mxu0 %v86_v58 }
 0x9a7   :  { %3978 = vmatpush3.msra.mxu0 %v86_v58 }
 0x9a8   :  { %4003 = vmatprep.subr.mxu0 %v4306_v42 }
 0xa58   :  { %v3951_v6 = vpop.f32.mrf.mxu0 }
 0xa59   :  { %v1629_v7 = vadd.f32 %v3951_v6, %v1550_v5 }
 0xa5a   :  { %v1623_v8 = vpop.f32.mrf.mxu0 }
 0xa5b   :  { %v4595_v9 = vadd.f32 %v1629_v7, %v4382_v4  ;;  %v1624_v17 = vadd.f32 %v1623_v8, %v1550_v5  ;;  %v1761_v5 = vsub.s32 5, %v4404_v28 }
 0xa5d   :  { %v4598_v10 = vadd.f32 %v1624_v17, %v4380_v3  ;;  %v1637_v11 = vsel %vm95_vm0, %v4595_v9, 0.0  ;;  %v1762_v6 = vrot.slane %v4407_v30, %v1761_v5 }
 0xa5e   :  { %1638 = vadd.xlane.f32.xlu1 %v1637_v11 }
 0xa5f   :  { %v1634_v12 = vsel %vm95_vm0, %v4598_v10, 0.0 }
 0xa60   :  { %1635 = vadd.xlane.f32.xlu0 %v1634_v12 }
 0xae7   :  { %v1639_v13 = vpop.xlane.xlu1 %1638 }
 0xae8   :  { %v1641_v14 = vmul.f32 0.03125, %v1639_v13 }
 0xae9   :  { %v1636_v16 = vpop.xlane.xlu0 %1635 }
 0xaea   :  { %v1640_v18 = vmul.f32 0.03125, %v1636_v16  ;;  %v1643_v19 = vsub.f32 %v4595_v9, %v1641_v14 }
 0xaec   :  { %v1642_v4 = vsub.f32 %v4598_v10, %v1640_v18  ;;  %v1645_v21 = vmul.f32 %v1643_v19, %v1643_v19 }
 0xaee   :  { %v1644_v20 = vmul.f32 %v1642_v4, %v1642_v4  ;;  %v1649_v22 = vsel %vm95_vm0, %v1645_v21, 0.0 }
 0xaf0   :  { %v1646_v3 = vsel %vm95_vm0, %v1644_v20, 0.0 }
 0xaf1   :  { %1647 = vadd.xlane.f32.xlu0 %v1646_v3 }
 0xaf5   :  { %1650 = vadd.xlane.f32.xlu0 %v1649_v22 }
 0xb7a   :  { %v1648_v35 = vpop.xlane.xlu0 %1647 }
 0xb7b   :  { %v1652_v36 = vmul.f32 0.03125, %v1648_v35 }
 0xb7d   :  { %v1654_v37 = vadd.f32 1e-05, %v1652_v36 }
 0xb7e   :  { %v1651_v38 = vpop.xlane.xlu0 %1650 }
 0xb7f   :  { %4171 = vrsqrt.f32 %v1654_v37  ;;  %v1653_v39 = vmul.f32 0.03125, %v1651_v38  ;;  %v4694_v37 = vld [vmem:[#allocation7 + $0x8] sm:$0xff] }
 0xb80   :  { %v1902_v38 = vrot.slane %v4694_v37, %v125_v29  ;;  %v1914_v29 = vrot.slane %v4694_v37, %v137_v43 }
 0xb81   :  { %v1655_v46 = vadd.f32 1e-05, %v1653_v39 }
 0xb83   :  { %4173 = vrsqrt.f32 %v1655_v46  ;;  %v1908_v46 = vrot.slane %v4694_v37, %v131_v31 }
 0xb8c   :  { %v4172_v44 = vpop.eup %4171 }
 0xb8d   :  { %v1658_v45 = vmul.f32 %v4172_v44, %v1642_v4 }
 0xb8f   :  { %v1664_v49 = vmul.f32 %v1663_v41, %v1658_v45 }
 0xb90   :  { %v4174_v50 = vpop.eup %4173 }
 0xb91   :  { %v1659_v51 = vmul.f32 %v4174_v50, %v1643_v19  ;;  %v1670_v52 = vadd.f32 %v1669_v47, %v1664_v49 }
 0xb93   :  { %v1665_v53 = vmul.f32 %v1663_v41, %v1659_v51  ;;  %3960 = vmatprep.mubr.msk.f32.mxu1 %vm95_vm0, %v1670_v52 }
 0xb95   :  { %v1671_v54 = vadd.f32 %v1669_v47, %v1665_v53 }
 0xb97   :  { %3961 = vmatmul.mubr.msk.f32.vlgmr.msra.gmra.mxu1 %vm95_vm0, %v1671_v54 }
 0xb98   :  { %3983 = vmatpush3.msra.mxu1 %v3680_v23 }
 0xb99   :  { %3984 = vmatprep.subr.mxu1 %v3679_v24 }
 0xb9a   :  { %3985 = vmatpush3.msra.mxu1 %v3679_v24 }
 0xb9b   :  { %3986 = vmatprep.subr.mxu1 %v3678_v25 }
 0xb9c   :  { %3987 = vmatpush3.msra.mxu1 %v3678_v25 }
 0xb9d   :  { %3988 = vmatprep.subr.mxu1 %v3677_v26 }
 0xb9e   :  { %3989 = vmatpush3.msra.mxu1 %v3677_v26 }
 0xb9f   :  { %3993 = vmatprep.subr.mxu1 %v4306_v42 }
 0xc57   :  { %v3962_v61 = vpop.f32.mrf.mxu1 }
 0xc58   :  { %v1754_v62 = vadd.f32 %v3962_v61, %v1675_v60 }
 0xc59   :  { %v1748_v63 = vpop.f32.mrf.mxu1 }
 0xc5a   :  { %v1749_v0 = vadd.f32 %v1748_v63, %v1675_v60  ;;  %v1758_v2 = vmax.f32 %v1754_v62, 0.0 }
 0xc5c   :  { %v1757_v1 = vmax.f32 %v1749_v0, 0.0 }
 0xc5e   :  { %3979 = vmatprep.mubr.msk.f32.mxu0 %vm1763_vm5, %v1757_v1 }
 0xc5f   :  { %3980 = vmatmul.mubr.msk.f32.vlgmr.msra.gmra.mxu0 %vm1763_vm5, %v1758_v2 }
 0xc60   :  { %4005 = vmatprep.mubr.msk.f32.mxu0 %vm4307_vm1, %v4306_v42 }
 0xd1f   :  { %v3981_v7 = vpop.f32.mrf.mxu0 }
 0xd20   :  { %v1842_v8 = vadd.f32 %v3981_v7, %v1762_v6 }
 0xd21   :  { %v1836_v17 = vpop.f32.mrf.mxu0 }
 0xd22   :  { %v4668_v11 = vadd.f32 %v1842_v8, %v4595_v9  ;;  %v1837_v12 = vadd.f32 %v1836_v17, %v1762_v6 }
 0xd24   :  { %v4671_v13 = vadd.f32 %v1837_v12, %v4598_v10  ;;  %v1876_v14 = vsel %vm95_vm0, %v4668_v11, 0.0 }
 0xd25   :  { %1877 = vadd.xlane.f32.xlu1 %v1876_v14 }
 0xd26   :  { %v1873_v16 = vsel %vm95_vm0, %v4671_v13, 0.0 }
 0xd27   :  { %1874 = vadd.xlane.f32.xlu0 %v1873_v16 }
 0xdae   :  { %v1878_v18 = vpop.xlane.xlu1 %1877 }
 0xdaf   :  { %v1880_v30 = vmul.f32 0.03125, %v1878_v18 }
 0xdb0   :  { %v1875_v19 = vpop.xlane.xlu0 %1874 }
 0xdb1   :  { %v1882_v4 = vsub.f32 %v4668_v11, %v1880_v30  ;;  %v1879_v20 = vmul.f32 0.03125, %v1875_v19 }
 0xdb3   :  { %v1881_v9 = vsub.f32 %v4671_v13, %v1879_v20  ;;  %v1884_v3 = vmul.f32 %v1882_v4, %v1882_v4 }
 0xdb5   :  { %v1888_v10 = vsel %vm95_vm0, %v1884_v3, 0.0  ;;  %v1883_v21 = vmul.f32 %v1881_v9, %v1881_v9 }
 0xdb6   :  { %1889 = vadd.xlane.f32.xlu1 %v1888_v10 }
 0xdb7   :  { %v1885_v22 = vsel %vm95_vm0, %v1883_v21, 0.0 }
 0xdb8   :  { %1886 = vadd.xlane.f32.xlu0 %v1885_v22 }
 0xe3f   :  { %v1890_v27 = vpop.xlane.xlu1 %1889 }
 0xe40   :  { %v1892_v32 = vmul.f32 0.03125, %v1890_v27 }
 0xe41   :  { %v1887_v33 = vpop.xlane.xlu0 %1886 }
 0xe42   :  { %v1894_v34 = vadd.f32 1e-05, %v1892_v32  ;;  %v1891_v35 = vmul.f32 0.03125, %v1887_v33 }
 0xe44   :  { %4175 = vrsqrt.f32 %v1894_v34  ;;  %v1893_v36 = vadd.f32 1e-05, %v1891_v35 }
 0xe46   :  { %4177 = vrsqrt.f32 %v1893_v36 }
 0xe51   :  { %v4176_v39 = vpop.eup %4175 }
 0xe52   :  { %v1898_v41 = vmul.f32 %v4176_v39, %v1882_v4 }
 0xe53   :  { %v4178_v44 = vpop.eup %4177 }
 0xe54   :  { %v1897_v45 = vmul.f32 %v4178_v44, %v1881_v9  ;;  %v1904_v47 = vmul.f32 %v1902_v38, %v1898_v41 }
 0xe56   :  { %v1903_v49 = vmul.f32 %v1902_v38, %v1897_v45  ;;  %v1910_v50 = vadd.f32 %v1908_v46, %v1904_v47 }
 0xe58   :  { %v1909_v51 = vadd.f32 %v1908_v46, %v1903_v49 }
 0xe5a   :  { %3990 = vmatprep.mubr.msk.f32.mxu1 %vm95_vm0, %v1909_v51 }
 0xe5b   :  { %3991 = vmatmul.mubr.msk.f32.vlgmr.msra.gmra.mxu1 %vm95_vm0, %v1910_v50 }
 0xe5c   :  { %3995 = vmatprep.mubr.msk.f32.mxu1 %vm4307_vm1, %v4306_v42 }
 0xf1b   :  { %v3992_v52 = vpop.f32.mrf.mxu1 }
 0xf1c   :  { %v4709_v31 = vadd.f32 %v3992_v52, %v1914_v29 }
 0xf1d   :  { %v1987_v53 = vpop.f32.mrf.mxu1 }
 0xf1e   :  { %v4711_v54 = vadd.f32 %v1987_v53, %v1914_v29  ;;  %2074 = vrot.lane.b32.xlu1 %v4709_v31, %s4308_s23 }
 0xf20   :  { %1997 = vrot.lane.b32.xlu0 %v4711_v54, %s4308_s23 }
 0xf22   :  { %2242 = vrot.lane.b32.xlu1 %v4709_v31, %s4309_s24 }
 0xf24   :  { %2166 = vrot.lane.b32.xlu0 %v4711_v54, %s4309_s24 }
 0xf26   :  { %2398 = vrot.lane.b32.xlu1 %v4709_v31, %s4310_s25 }
 0xf2a   :  { %2320 = vrot.lane.b32.xlu1 %v4711_v54, %s4310_s25 }
 0xf90   :  { %v2075_v55 = vpop.permute.xlu1 %2074 }
 0xf92   :  { %v1998_v43 = vpop.permute.xlu0 %1997 }
 0xf93   :  { %3994 = vmatpush3.xpose.msk.msra.mxu1 %vm223_vm2, %v1998_v43 }
 0xf94   :  { %3998 = vmatprep.subr.mxu1 %v4306_v42  ;;  %v2243_v57 = vpop.permute.xlu1 %2242 }
 0xf96   :  { %3996 = vmatmul.mubr.msk.f32.vlgmr.msra.gmra.mxu1 %vm223_vm2, %v4711_v54  ;;  %v2167_v56 = vpop.permute.xlu0 %2166 }
 0xf97   :  { %3999 = vmatpush3.xpose.msk.msra.mxu1 %vm223_vm2, %v2075_v55  ;;  %4004 = vmatpush3.msra.mxu0 %v2167_v56 }
 0xf98   :  { %4000 = vmatprep.mubr.msk.f32.mxu1 %vm4307_vm1, %v4306_v42  ;;  %4008 = vmatprep.subr.mxu1 %v4306_v42  ;;  %v2399_v12 = vpop.permute.xlu1 %2398 }
 0xf99   :  { %4013 = vmatprep.subr.mxu0 %v4306_v42 }
 0xf9a   :  { %4001 = vmatmul.mubr.msk.f32.vlgmr.msra.gmra.mxu1 %vm223_vm2, %v4709_v31 }
 0xf9b   :  { %4009 = vmatpush3.msra.mxu1 %v2243_v57  ;;  %4010 = vmatprep.mubr.msk.f32.mxu1 %vm4307_vm1, %v4306_v42 }
 0xf9c   :  { %4018 = vmatprep.subr.mxu1 %v4306_v42  ;;  %v2321_v14 = vpop.permute.xlu1 %2320 }
0x1056   :  { %v2069_v58 = vpop.f32.mrf.mxu1 }
0x1057   :  { %v2150_v60 = vmul.f32 9.094947e-13, %v2069_v58 }
0x1058   :  { %v3997_v61 = vpop.f32.mrf.mxu1 }
0x1059   :  { %v2152_v62 = vmul.f32 1.442695, %v2150_v60 }
0x105a   :  { %v2146_v63 = vpop.f32.mrf.mxu1 }
0x105b   :  { %4179 = vpow2.f32 %v2152_v62  ;;  %v2151_v0 = vmul.f32 9.094947e-13, %v2146_v63 }
0x105c   :  { %v4002_v1 = vpop.f32.mrf.mxu1 }
0x105d   :  { %v2154_v2 = vmul.f32 1.442695, %v2151_v0 }
0x105f   :  { %4181 = vpow2.f32 %v2154_v2 }
0x1068   :  { %v4180_v6 = vpop.eup %4179 }
0x1069   :  { %v2156_v7 = vsel %vm223_vm2, %v4180_v6, 0.0 }
0x106a   :  { %2157 = vadd.xlane.f32.xlu1 %v2156_v7 }
0x106c   :  { %v4182_v8 = vpop.eup %4181 }
0x106d   :  { %v2159_v17 = vsel %vm223_vm2, %v4182_v8, 0.0 }
0x106e   :  { %2160 = vadd.xlane.f32.xlu0 %v2159_v17 }
0x107b   :  { %2396 = vrot.lane.b32.xlu1 %v4709_v31, %s4311_s26 }
0x107f   :  { %2566 = vrot.lane.b32.xlu1 %v4709_v31, %s4312_s27 }
0x1083   :  { %2722 = vrot.lane.b32.xlu1 %v4709_v31, %s4313_s28 }
0x1084   :  { %2318 = vrot.lane.b32.xlu0 %v4711_v54, %s4311_s26 }
0x1088   :  { %2490 = vrot.lane.b32.xlu0 %v4711_v54, %s4312_s27 }
0x10f3   :  { %v2158_v16 = vpop.xlane.xlu1 %2157 }
0x10f4   :  { %4183 = vrcp.f32 %v2158_v16 }
0x10f7   :  { %v2161_v18 = vpop.xlane.xlu0 %2160  ;;  %v2397_v9 = vpop.permute.xlu1 %2396 }
0x10f8   :  { %4185 = vrcp.f32 %v2161_v18 }
0x10fb   :  { %v2319_v19 = vpop.permute.xlu0 %2318  ;;  %v2567_v21 = vpop.permute.xlu1 %2566 }
0x10ff   :  { %v2491_v10 = vpop.permute.xlu0 %2490  ;;  %v2723_v45 = vpop.permute.xlu1 %2722 }
0x1101   :  { %v4184_v30 = vpop.eup %4183 }
0x1102   :  { %v2163_v4 = vmul.f32 %v4184_v30, %v4180_v6 }
0x1104   :  { %4006 = vmatmul.mubr.msk.f32.vlgmr.msra.gmra.mxu0 %vm223_vm2, %v2163_v4 }
0x1105   :  { %v4186_v20 = vpop.eup %4185  ;;  %4014 = vmatpush3.xpose.msk.msra.mxu0 %vm223_vm2, %v2321_v14  ;;  %4015 = vmatprep.mubr.msk.f32.mxu0 %vm4307_vm1, %v4306_v42 }
0x1106   :  { %4023 = vmatprep.subr.mxu0 %v4306_v42  ;;  %v2165_v3 = vmul.f32 %v4186_v20, %v4182_v8 }
0x1108   :  { %4011 = vmatmul.mubr.msk.f32.vlgmr.msra.gmra.mxu1 %vm223_vm2, %v2165_v3  ;;  %4016 = vmatmul.mubr.msk.f32.vlgmr.msra.gmra.mxu0 %vm223_vm2, %v2319_v19 }
0x1109   :  { %4019 = vmatpush3.xpose.msk.msra.mxu1 %vm223_vm2, %v2399_v12  ;;  %4024 = vmatpush3.msra.mxu0 %v2491_v10 }
0x110a   :  { %4020 = vmatprep.mubr.msk.f32.mxu1 %vm4307_vm1, %v4306_v42  ;;  %4028 = vmatprep.subr.mxu1 %v4306_v42 }
0x110b   :  { %4025 = vmatprep.mubr.msk.f32.mxu0 %vm4307_vm1, %v4306_v42  ;;  %4033 = vmatprep.subr.mxu0 %v4306_v42 }
0x110c   :  { %4021 = vmatmul.mubr.msk.f32.vlgmr.msra.gmra.mxu1 %vm223_vm2, %v2397_v9 }
0x110d   :  { %4029 = vmatpush3.msra.mxu1 %v2567_v21  ;;  %4030 = vmatprep.mubr.msk.f32.mxu1 %vm4307_vm1, %v4306_v42 }
0x110e   :  { %4038 = vmatprep.subr.mxu1 %v4306_v42 }
0x11c4   :  { %v4769_v22 = vpop.f32.mrf.mxu0 }
0x11c6   :  { %v4007_v23 = vpop.f32.mrf.mxu0 }
0x11c8   :  { %v4771_v24 = vpop.f32.mrf.mxu1  ;;  %v2392_v25 = vpop.f32.mrf.mxu0 }
0x11c9   :  { %v2474_v26 = vmul.f32 9.094947e-13, %v2392_v25 }
0x11ca   :  { %v4012_v27 = vpop.f32.mrf.mxu1  ;;  %v4017_v32 = vpop.f32.mrf.mxu0 }
0x11cb   :  { %v2476_v33 = vmul.f32 1.442695, %v2474_v26 }
0x11cc   :  { %v2470_v34 = vpop.f32.mrf.mxu1 }
0x11cd   :  { %4187 = vpow2.f32 %v2476_v33  ;;  %v2475_v35 = vmul.f32 9.094947e-13, %v2470_v34 }
0x11ce   :  { %v4022_v36 = vpop.f32.mrf.mxu1 }
0x11cf   :  { %v2478_v38 = vmul.f32 1.442695, %v2475_v35 }
0x11d1   :  { %4189 = vpow2.f32 %v2478_v38 }
0x11da   :  { %v4188_v39 = vpop.eup %4187 }
0x11db   :  { %v2480_v46 = vsel %vm223_vm2, %v4188_v39, 0.0 }
0x11dc   :  { %2481 = vadd.xlane.f32.xlu0 %v2480_v46 }
0x11de   :  { %v4190_v41 = vpop.eup %4189 }
0x11df   :  { %v2483_v44 = vsel %vm223_vm2, %v4190_v41, 0.0 }
0x11e0   :  { %2484 = vadd.xlane.f32.xlu1 %v2483_v44 }
0x11f1   :  { %2720 = vrot.lane.b32.xlu1 %v4709_v31, %s4314_s8 }
0x11f2   :  { %2644 = vrot.lane.b32.xlu0 %v4711_v54, %s4313_s28 }
0x11f5   :  { %2890 = vrot.lane.b32.xlu1 %v4709_v31, %s4315_s9 }
0x11f6   :  { %2642 = vrot.lane.b32.xlu0 %v4711_v54, %s4314_s8 }
0x11f9   :  { %3046 = vrot.lane.b32.xlu1 %v4709_v31, %s4316_s10 }
0x11fa   :  { %2814 = vrot.lane.b32.xlu0 %v4711_v54, %s4315_s9 }
0x1265   :  { %v2482_v47 = vpop.xlane.xlu0 %2481 }
0x1266   :  { %4191 = vrcp.f32 %v2482_v47 }
0x1269   :  { %v2485_v49 = vpop.xlane.xlu1 %2484  ;;  %v2645_v50 = vpop.permute.xlu0 %2644 }
0x126a   :  { %4193 = vrcp.f32 %v2485_v49 }
0x126d   :  { %v2643_v29 = vpop.permute.xlu0 %2642  ;;  %v2721_v43 = vpop.permute.xlu1 %2720 }
0x1271   :  { %v2815_v56 = vpop.permute.xlu0 %2814  ;;  %v2891_v57 = vpop.permute.xlu1 %2890 }
0x1273   :  { %v4192_v51 = vpop.eup %4191 }
0x1274   :  { %v2487_v52 = vmul.f32 %v4192_v51, %v4188_v39 }
0x1275   :  { %v3047_v30 = vpop.permute.xlu1 %3046 }
0x1276   :  { %4026 = vmatmul.mubr.msk.f32.vlgmr.msra.gmra.mxu0 %vm223_vm2, %v2487_v52 }
0x1277   :  { %v4194_v53 = vpop.eup %4193  ;;  %4034 = vmatpush3.xpose.msk.msra.mxu0 %vm223_vm2, %v2645_v50  ;;  %4035 = vmatprep.mubr.msk.f32.mxu0 %vm4307_vm1, %v4306_v42 }
0x1278   :  { %4043 = vmatprep.subr.mxu0 %v4306_v42  ;;  %v2489_v55 = vmul.f32 %v4194_v53, %v4190_v41 }
0x127a   :  { %4031 = vmatmul.mubr.msk.f32.vlgmr.msra.gmra.mxu1 %vm223_vm2, %v2489_v55  ;;  %4036 = vmatmul.mubr.msk.f32.vlgmr.msra.gmra.mxu0 %vm223_vm2, %v2643_v29  ;;  %v3684_v55 = vld [vmem:[%s4954_s4 + $0x38] sm:$0xff] }
0x127b   :  { %4039 = vmatpush3.xpose.msk.msra.mxu1 %vm223_vm2, %v2723_v45  ;;  %4044 = vmatpush3.msra.mxu0 %v2815_v56  ;;  %v3683_v56 = vld [vmem:[%s4954_s4 + $0x30] sm:$0xff] }
0x127c   :  { %4040 = vmatprep.mubr.msk.f32.mxu1 %vm4307_vm1, %v4306_v42  ;;  %4048 = vmatprep.subr.mxu1 %v4306_v42 }
0x127d   :  { %4045 = vmatprep.mubr.msk.f32.mxu0 %vm4307_vm1, %v4306_v42  ;;  %4053 = vmatprep.subr.mxu0 %v4306_v42 }
0x127e   :  { %4041 = vmatmul.mubr.msk.f32.vlgmr.msra.gmra.mxu1 %vm223_vm2, %v2721_v43 }
0x127f   :  { %4049 = vmatpush3.msra.mxu1 %v2891_v57  ;;  %4050 = vmatprep.mubr.msk.f32.mxu1 %vm4307_vm1, %v4306_v42  ;;  %v3682_v57 = vld [vmem:[%s4954_s4 + $0x28] sm:$0xff] }
0x1280   :  { %4058 = vmatprep.subr.mxu1 %v4306_v42 }
0x1336   :  { %v4805_v58 = vpop.f32.mrf.mxu0 }
0x1338   :  { %v4027_v60 = vpop.f32.mrf.mxu0 }
0x133a   :  { %v4807_v61 = vpop.f32.mrf.mxu1  ;;  %v2716_v62 = vpop.f32.mrf.mxu0 }
0x133b   :  { %v2798_v63 = vmul.f32 9.094947e-13, %v2716_v62 }
0x133c   :  { %v4032_v0 = vpop.f32.mrf.mxu1  ;;  %v4037_v1 = vpop.f32.mrf.mxu0 }
0x133d   :  { %v2800_v2 = vmul.f32 1.442695, %v2798_v63 }
0x133e   :  { %v2794_v6 = vpop.f32.mrf.mxu1 }
0x133f   :  { %4195 = vpow2.f32 %v2800_v2  ;;  %v2799_v7 = vmul.f32 9.094947e-13, %v2794_v6 }
0x1340   :  { %v4042_v8 = vpop.f32.mrf.mxu1 }
0x1341   :  { %v2802_v17 = vmul.f32 1.442695, %v2799_v7 }
0x1343   :  { %4197 = vpow2.f32 %v2802_v17 }
0x134c   :  { %v4196_v12 = vpop.eup %4195 }
0x134d   :  { %v2804_v14 = vsel %vm223_vm2, %v4196_v12, 0.0 }
0x134e   :  { %2805 = vadd.xlane.f32.xlu0 %v2804_v14 }
0x1350   :  { %v4198_v16 = vpop.eup %4197 }
0x1351   :  { %v2807_v18 = vsel %vm223_vm2, %v4198_v16, 0.0 }
0x1352   :  { %2808 = vadd.xlane.f32.xlu1 %v2807_v18 }
0x1363   :  { %3044 = vrot.lane.b32.xlu1 %v4709_v31, %s4317_s11 }
0x1364   :  { %2968 = vrot.lane.b32.xlu0 %v4711_v54, %s4316_s10 }
0x1368   :  { %2966 = vrot.lane.b32.xlu0 %v4711_v54, %s4317_s11 }
0x13d7   :  { %v2806_v19 = vpop.xlane.xlu0 %2805 }
0x13d8   :  { %4199 = vrcp.f32 %v2806_v19 }
0x13db   :  { %v2809_v4 = vpop.xlane.xlu1 %2808  ;;  %v2969_v9 = vpop.permute.xlu0 %2968 }
0x13dc   :  { %4201 = vrcp.f32 %v2809_v4 }
0x13df   :  { %v2967_v23 = vpop.permute.xlu0 %2966  ;;  %v3045_v25 = vpop.permute.xlu1 %3044 }
0x13e5   :  { %v4200_v20 = vpop.eup %4199 }
0x13e6   :  { %v2811_v3 = vmul.f32 %v4200_v20, %v4196_v12 }
0x13e8   :  { %4046 = vmatmul.mubr.msk.f32.vlgmr.msra.gmra.mxu0 %vm223_vm2, %v2811_v3 }
0x13e9   :  { %v4202_v10 = vpop.eup %4201  ;;  %4054 = vmatpush3.xpose.msk.msra.mxu0 %vm223_vm2, %v2969_v9  ;;  %4055 = vmatprep.mubr.msk.f32.mxu0 %vm4307_vm1, %v4306_v42 }
0x13ea   :  { %v2813_v21 = vmul.f32 %v4202_v10, %v4198_v16  ;;  %4063 = vmatprep.subr.mxu0 %v4306_v42 }
0x13ec   :  { %4051 = vmatmul.mubr.msk.f32.vlgmr.msra.gmra.mxu1 %vm223_vm2, %v2813_v21  ;;  %4056 = vmatmul.mubr.msk.f32.vlgmr.msra.gmra.mxu0 %vm223_vm2, %v2967_v23 }
0x13ed   :  { %4059 = vmatpush3.xpose.msk.msra.mxu1 %vm223_vm2, %v3047_v30  ;;  %4060 = vmatprep.mubr.msk.f32.mxu1 %vm4307_vm1, %v4306_v42 }
0x13ee   :  { %4068 = vmatprep.subr.mxu1 %v4306_v42  ;;  %4065 = vmatprep.mubr.msk.f32.mxu0 %vm4307_vm1, %v4306_v42 }
0x13f0   :  { %4061 = vmatmul.mubr.msk.f32.vlgmr.msra.gmra.mxu1 %vm223_vm2, %v3045_v25 }
0x13f1   :  { %4070 = vmatprep.mubr.msk.f32.mxu1 %vm4307_vm1, %v4306_v42 }
0x14a8   :  { %v2886_v26 = vpop.f32.mrf.mxu0 }
0x14aa   :  { %v4047_v27 = vpop.f32.mrf.mxu0 }
0x14ac   :  { %v2962_v32 = vpop.f32.mrf.mxu1  ;;  %v3040_v33 = vpop.f32.mrf.mxu0 }
0x14ad   :  { %v3122_v34 = vmul.f32 9.094947e-13, %v3040_v33 }
0x14ae   :  { %v4052_v35 = vpop.f32.mrf.mxu1  ;;  %v4057_v36 = vpop.f32.mrf.mxu0 }
0x14af   :  { %v3124_v38 = vmul.f32 1.442695, %v3122_v34  ;;  %v3688_v35 = vld [vmem:[%s4955_s5 + $0x38] sm:$0xff]  ;;  %v3687_v36 = vld [vmem:[%s4955_s5 + $0x30] sm:$0xff] }
0x14b0   :  { %v3118_v39 = vpop.f32.mrf.mxu1 }
0x14b1   :  { %4203 = vpow2.f32 %v3124_v38  ;;  %v3123_v46 = vmul.f32 9.094947e-13, %v3118_v39  ;;  %v3686_v38 = vld [vmem:[%s4955_s5 + $0x28] sm:$0xff]  ;;  %v3685_v39 = vld [vmem:[%s4955_s5 + $0x20] sm:$0xff] }
0x14b2   :  { %v4062_v41 = vpop.f32.mrf.mxu1 }
0x14b3   :  { %v3126_v44 = vmul.f32 1.442695, %v3123_v46  ;;  %v3696_v46 = vld [vmem:[%s4956_s6 + $0x78] sm:$0xff]  ;;  %v3695_v41 = vld [vmem:[%s4956_s6 + $0x70] sm:$0xff] }
0x14b5   :  { %4205 = vpow2.f32 %v3126_v44  ;;  %v3694_v44 = vld [vmem:[%s4956_s6 + $0x68] sm:$0xff] }
0x14be   :  { %v4204_v45 = vpop.eup %4203 }
0x14bf   :  { %v3128_v47 = vsel %vm223_vm2, %v4204_v45, 0.0 }
0x14c0   :  { %3129 = vadd.xlane.f32.xlu0 %v3128_v47 }
0x14c2   :  { %v4206_v49 = vpop.eup %4205 }
0x14c3   :  { %v3131_v42 = vsel %vm223_vm2, %v4206_v49, 0.0 }
0x14c4   :  { %3132 = vadd.xlane.f32.xlu1 %v3131_v42 }
0x14d5   :  { %3214 = vrot.lane.b32.xlu1 %v4709_v31, %s4318_s12 }
0x14d6   :  { %3138 = vrot.lane.b32.xlu0 %v4711_v54, %s4318_s12 }
0x14d9   :  { %3294 = vrot.lane.b32.xlu1 %v4807_v61, %s4304_s30 }
0x14da   :  { %3292 = vrot.lane.b32.xlu0 %v4805_v58, %s4304_s30  ;;  %v3681_v58 = vld [vmem:[%s4954_s4 + $0x20] sm:$0xff] }
0x14dd   :  { %3302 = vrot.lane.b32.xlu1 %v2962_v32, %s4319_s13 }
0x14de   :  { %3300 = vrot.lane.b32.xlu0 %v2886_v26, %s4319_s13 }
0x1549   :  { %v3130_v50 = vpop.xlane.xlu0 %3129 }
0x154a   :  { %4207 = vrcp.f32 %v3130_v50 }
0x154d   :  { %v3133_v51 = vpop.xlane.xlu1 %3132  ;;  %v3139_v29 = vpop.permute.xlu0 %3138 }
0x154e   :  { %4209 = vrcp.f32 %v3133_v51  ;;  %4064 = vmatpush3.msra.mxu0 %v3139_v29 }
0x154f   :  { %4073 = vmatprep.subr.mxu0 %v3684_v55 }
0x1551   :  { %v3215_v31 = vpop.permute.xlu1 %3214  ;;  %v3293_v0 = vpop.permute.xlu0 %3292 }
0x1552   :  { %4069 = vmatpush3.msra.mxu1 %v3215_v31  ;;  %v3314_v6 = vsel %vm223_vm2, %v4769_v22, %v3293_v0  ;;  %v3323_v22 = vrot.slane %v4694_v37, %v1549_v15  ;;  %v3436_v31 = vrot.slane %v4694_v37, %v1662_v48  ;;  %v3692_v48 = vld [vmem:[%s4956_s6 + $0x58] sm:$0xff] }
0x1553   :  { %4084 = vmatprep.subr.mxu1 %v3688_v35 }
0x1555   :  { %v3295_v1 = vpop.permute.xlu1 %3294  ;;  %v3301_v2 = vpop.permute.xlu0 %3300 }
0x1556   :  { %v3316_v7 = vsel %vm1541_vm3, %v3314_v6, %v3301_v2  ;;  %v3315_v14 = vsel %vm223_vm2, %v4771_v24, %v3295_v1 }
0x1557   :  { %v4208_v52 = vpop.eup %4207 }
0x1558   :  { %v3135_v54 = vmul.f32 %v4208_v52, %v4204_v45  ;;  %v3693_v45 = vld [vmem:[%s4956_s6 + $0x60] sm:$0xff] }
0x1559   :  { %v3303_v8 = vpop.permute.xlu1 %3302 }
0x155a   :  { %4066 = vmatmul.mubr.msk.f32.vlgmr.msra.gmra.mxu0 %vm223_vm2, %v3135_v54  ;;  %v3317_v16 = vsel %vm1541_vm3, %v3315_v14, %v3303_v8 }
0x155b   :  { %v4210_v53 = vpop.eup %4209  ;;  %4074 = vmatpush3.msra.mxu0 %v3684_v55 }
0x155c   :  { %v3137_v43 = vmul.f32 %v4210_v53, %v4206_v49  ;;  %4075 = vmatprep.subr.mxu0 %v3683_v56  ;;  %v3442_v53 = vrot.slane %v4694_v37, %v1668_v40  ;;  %v3691_v40 = vld [vmem:[%s4956_s6 + $0x50] sm:$0xff] }
0x155d   :  { %4076 = vmatpush3.msra.mxu0 %v3683_v56 }
0x155e   :  { %4071 = vmatmul.mubr.msk.f32.vlgmr.msra.gmra.mxu1 %vm223_vm2, %v3137_v43  ;;  %4077 = vmatprep.subr.mxu0 %v3682_v57 }
0x155f   :  { %4078 = vmatpush3.msra.mxu0 %v3682_v57  ;;  %4085 = vmatpush3.msra.mxu1 %v3688_v35 }
0x1560   :  { %4079 = vmatprep.subr.mxu0 %v3681_v58  ;;  %4086 = vmatprep.subr.mxu1 %v3687_v36 }
0x1561   :  { %4080 = vmatpush3.msra.mxu0 %v3681_v58  ;;  %4087 = vmatpush3.msra.mxu1 %v3687_v36 }
0x1562   :  { %4088 = vmatprep.subr.mxu1 %v3686_v38  ;;  %4095 = vmatprep.subr.mxu0 %v3696_v46 }
0x1563   :  { %4089 = vmatpush3.msra.mxu1 %v3686_v38 }
0x1564   :  { %4090 = vmatprep.subr.mxu1 %v3685_v39 }
0x1565   :  { %4091 = vmatpush3.msra.mxu1 %v3685_v39 }
0x161a   :  { %v3210_v60 = vpop.f32.mrf.mxu0 }
0x161b   :  { %3308 = vrot.lane.b32.xlu0 %v3210_v60, %s4320_s19 }
0x161c   :  { %v4067_v61 = vpop.f32.mrf.mxu0 }
0x161d   :  { %v3690_v61 = vld [vmem:[%s4956_s6 + $0x48] sm:$0xff] }
0x161e   :  { %v3286_v62 = vpop.f32.mrf.mxu1 }
0x161f   :  { %3310 = vrot.lane.b32.xlu1 %v3286_v62, %s4320_s19  ;;  %v3689_v62 = vld [vmem:[%s4956_s6 + $0x40] sm:$0xff]  ;;  %s4321_s6 = smov [#allocation8]  }
0x1620   :  { %v4072_v63 = vpop.f32.mrf.mxu1  ;;  %s3632_s27 = sshll.u32 %s4321_s6, 4  ;;  %s3633_s27 = int_to_ptr.vmem [resolvable:$true] %s3632_s27 }
0x1621   :  { %v3448_v63 = vrot.slane %v4694_v37, %v1674_v59  ;;  %s4275_s28 = scalar_lea.vmem %s3633_s27, 256  ;;  %p4280_p2 = scmp.lt.s32.totalorder %s3633_s27, %s3633_s27 }
0x1622   :  { %p4276_p1 = scmp.ne.s32.totalorder %s3633_s27, %s4275_s28  ;;  %p4281_p3 = scmp.lt.s32.totalorder %s4275_s28, %s4275_s28 }
0x1624   :  { %p4282_p4 = por %p4281_p3, %p4280_p2 }
0x1626   :  { %p4283_p5 = pnand %p4282_p4, %p4276_p1 }
0x168d   :  { %v3309_v17 = vpop.permute.xlu0 %3308 }
0x168e   :  { %v3318_v12 = vsel %vm1544_vm4, %v3316_v7, %v3309_v17  ;;  %v3535_v17 = vrot.slane %v4694_v37, %v1761_v5 }
0x168f   :  { %4081 = vmatprep.mubr.msk.f32.mxu0 %vm95_vm0, %v3318_v12 }
0x1691   :  { %v3311_v18 = vpop.permute.xlu1 %3310 }
0x1692   :  { %v3319_v30 = vsel %vm1544_vm4, %v3317_v16, %v3311_v18  ;;  %v3729_v16 = vld [vmem:[#allocation5 + $0x8] ss:$0 sm:$0xff] }
0x1693   :  { %4082 = vmatmul.mubr.msk.f32.vlgmr.msra.gmra.mxu0 %vm95_vm0, %v3319_v30 }
0x1694   :  { %4096 = vmatpush3.msra.mxu0 %v3696_v46 }
0x1695   :  { %4097 = vmatprep.subr.mxu0 %v3695_v41 }
0x1696   :  { %4098 = vmatpush3.msra.mxu0 %v3695_v41 }
0x1697   :  { %4099 = vmatprep.subr.mxu0 %v3694_v44 }
0x1698   :  { %4100 = vmatpush3.msra.mxu0 %v3694_v44 }
0x1699   :  { %4101 = vmatprep.subr.mxu0 %v3693_v45 }
0x169a   :  { %4102 = vmatpush3.msra.mxu0 %v3693_v45 }
0x169b   :  { %4103 = vmatprep.subr.mxu0 %v3692_v48 }
0x169c   :  { %4104 = vmatpush3.msra.mxu0 %v3692_v48 }
0x169d   :  { %4105 = vmatprep.subr.mxu0 %v3691_v40 }
0x169e   :  { %4106 = vmatpush3.msra.mxu0 %v3691_v40 }
0x169f   :  { %4107 = vmatprep.subr.mxu0 %v3690_v61 }
0x16a0   :  { %4108 = vmatpush3.msra.mxu0 %v3690_v61 }
0x16a1   :  { %4109 = vmatprep.subr.mxu0 %v3689_v62 }
0x16a2   :  { %4110 = vmatpush3.msra.mxu0 %v3689_v62 }
0x1753   :  { %v4083_v19 = vpop.f32.mrf.mxu0 }
0x1754   :  { %v3402_v4 = vadd.f32 %v4083_v19, %v3323_v22 }
0x1755   :  { %v3396_v20 = vpop.f32.mrf.mxu0 }
0x1756   :  { %v4875_v9 = vadd.f32 %v3402_v4, %v4668_v11  ;;  %v3397_v3 = vadd.f32 %v3396_v20, %v3323_v22 }
0x1758   :  { %v4878_v24 = vadd.f32 %v3397_v3, %v4671_v13  ;;  %v3410_v10 = vsel %vm95_vm0, %v4875_v9, 0.0 }
0x1759   :  { %3411 = vadd.xlane.f32.xlu1 %v3410_v10 }
0x175a   :  { %v3407_v21 = vsel %vm95_vm0, %v4878_v24, 0.0 }
0x175b   :  { %3408 = vadd.xlane.f32.xlu0 %v3407_v21 }
0x17e2   :  { %v3412_v23 = vpop.xlane.xlu1 %3411 }
0x17e3   :  { %v3414_v15 = vmul.f32 0.03125, %v3412_v23 }
0x17e4   :  { %v3409_v25 = vpop.xlane.xlu0 %3408 }
0x17e5   :  { %v3413_v26 = vmul.f32 0.03125, %v3409_v25  ;;  %v3416_v27 = vsub.f32 %v4875_v9, %v3414_v15 }
0x17e7   :  { %v3415_v11 = vsub.f32 %v4878_v24, %v3413_v26  ;;  %v3418_v33 = vmul.f32 %v3416_v27, %v3416_v27 }
0x17e9   :  { %v3417_v32 = vmul.f32 %v3415_v11, %v3415_v11  ;;  %v3422_v34 = vsel %vm95_vm0, %v3418_v33, 0.0 }
0x17eb   :  { %v3419_v13 = vsel %vm95_vm0, %v3417_v32, 0.0 }
0x17ec   :  { %3420 = vadd.xlane.f32.xlu0 %v3419_v13 }
0x17f0   :  { %3423 = vadd.xlane.f32.xlu0 %v3422_v34 }
0x1875   :  { %v3421_v47 = vpop.xlane.xlu0 %3420 }
0x1876   :  { %v3425_v49 = vmul.f32 0.03125, %v3421_v47 }
0x1878   :  { %v3427_v42 = vadd.f32 1e-05, %v3425_v49 }
0x1879   :  { %v3424_v50 = vpop.xlane.xlu0 %3423 }
0x187a   :  { %4211 = vrsqrt.f32 %v3427_v42  ;;  %v3426_v51 = vmul.f32 0.03125, %v3424_v50 }
0x187c   :  { %v3428_v29 = vadd.f32 1e-05, %v3426_v51 }
0x187e   :  { %4213 = vrsqrt.f32 %v3428_v29 }
0x1887   :  { %v4212_v52 = vpop.eup %4211 }
0x1888   :  { %v3431_v54 = vmul.f32 %v4212_v52, %v3415_v11 }
0x188a   :  { %v3437_v43 = vmul.f32 %v3436_v31, %v3431_v54 }
0x188b   :  { %v4214_v55 = vpop.eup %4213 }
0x188c   :  { %v3432_v56 = vmul.f32 %v4214_v55, %v3416_v27  ;;  %v3443_v57 = vadd.f32 %v3442_v53, %v3437_v43 }
0x188e   :  { %v3438_v58 = vmul.f32 %v3436_v31, %v3432_v56  ;;  %4092 = vmatprep.mubr.msk.f32.mxu1 %vm95_vm0, %v3443_v57 }
0x1890   :  { %v3444_v60 = vadd.f32 %v3442_v53, %v3438_v58 }
0x1892   :  { %4093 = vmatmul.mubr.msk.f32.vlgmr.msra.gmra.mxu1 %vm95_vm0, %v3444_v60 }
0x1952   :  { %v4094_v0 = vpop.f32.mrf.mxu1 }
0x1953   :  { %v3527_v1 = vadd.f32 %v4094_v0, %v3448_v63 }
0x1954   :  { %v3521_v2 = vpop.f32.mrf.mxu1 }
0x1955   :  { %v3522_v6 = vadd.f32 %v3521_v2, %v3448_v63  ;;  %v3531_v8 = vmax.f32 %v3527_v1, 0.0 }
0x1957   :  { %v3530_v7 = vmax.f32 %v3522_v6, 0.0 }
0x1959   :  { %4111 = vmatprep.mubr.msk.f32.mxu0 %vm1763_vm5, %v3530_v7 }
0x195a   :  { %4112 = vmatmul.mubr.msk.f32.vlgmr.msra.gmra.mxu0 %vm1763_vm5, %v3531_v8 }
0x1a1a   :  { %v4113_v12 = vpop.f32.mrf.mxu0 }
0x1a1b   :  { %v3614_v14 = vadd.f32 %v4113_v12, %v3535_v17 }
0x1a1c   :  { %v3608_v18 = vpop.f32.mrf.mxu0 }
0x1a1d   :  { %v3618_v59 = vadd.f32 %v3614_v14, %v4875_v9  ;;  %v3609_v30 = vadd.f32 %v3608_v18, %v3535_v17 }
0x1a1f   :  { %v3624_v22 = vadd.f32 %v3729_v16, %v3618_v59  ;;  %v3617_v19 = vadd.f32 %v3609_v30, %v4878_v24 }
0x1a21   :  { %3626 = vst.msk [vmem:[#allocation8 + $0x8] sm:$0xff] %vm95_vm0, %v3624_v22  ;;  %v3623_v4 = vadd.f32 %v3729_v16, %v3617_v19 }
0x1a23   :  { %3625 = vst.msk [vmem:[#allocation8] sm:$0xff] %vm95_vm0, %v3623_v4 }
0x1a24   :  { %4286 = shalt.err (!%p4283_p5)
}
0x1a25   :  { %3638 = dma.vmem_to_hbm [thread:$0]  %s3633_s27, 256, %s4957_s7, [#allocation4], %s4303_s29, %s4303_s29, %s4304_s30  }
0x1a26   :  { %4299 = dma.done.wait [#allocation4], 256  }
0x1a27   :  { %4300 = vsyncadd [#allocation4], 4294967040 }
0x1a28   :  { %3642 = vsyncpa [#allocation3], 1 }
0x1a29   :  { %3643 = vsyncpa [#allocation6], 1 }
0x1a2a   :  { %3644 = vsyncpa [#allocation4], 1 }

</bundles_post_ra>
